<compile_context>
chip_gen: v7x
topology: tpu7x:2x2x1
jax: 0.10.0
libtpu: 0.0.40
codegen_flags: <defaults>
</compile_context>

<pallas_src>
import functools

import jax
import jax.numpy as jnp
import numpy as np
from jax import lax
from jax.experimental import pallas as pl
from jax.experimental.pallas import tpu as pltpu


def _round_up(x, m):
    return (x + m - 1) // m * m


# ----------------------------------------------------------------------------
# Pallas kernel: fused depthwise-3x3/s2 + pointwise-1x1 + folded BN as a single
# im2col matmul.  Processes the whole (batch-flattened) pyramid level at once.
# ----------------------------------------------------------------------------
def _fused_sepconv_bn_kernel(xph_ref, w_ref, b_ref, out_ref, patches_ref,
                             *, rows, C, Wo):
    # xph_ref:     (4, Rpad, C)  parity phases of the zero-padded input,
    #                            rows flattened over (n, i, j), zero-padded rows
    # w_ref:       (9*C, C)      merged depthwise * pointwise * BN-scale weight
    # b_ref:       (1, C)        folded BN bias
    # out_ref:     (rows, C)     flattened (n, i, j) output (superset of valid rows)
    # patches_ref: (rows, 9*C)   VMEM scratch holding the im2col patch matrix
    xph = xph_ref[...]                       # tiny: whole level is VMEM-resident

    # Build the im2col patch matrix: tap (kh, kw) lives in phase (kh%2, kw%2)
    # at a constant flat-row offset s -- a static, contiguous, stride-1 slice.
    for kh in range(3):
        for kw in range(3):
            k = kh * 3 + kw
            qp = (kh % 2) * 2 + (kw % 2)
            s = (kh // 2) * (Wo + 1) + (kw // 2)
            patches_ref[:, k * C:(k + 1) * C] = xph[qp, s:s + rows, :]

    # Single MXU matmul for the whole level (depthwise + pointwise + BN scale
    # all folded into w_ref), then the folded BN bias.
    # TODO(synk): cast operands to bf16 at production channel counts.
    y = jnp.dot(patches_ref[...], w_ref[...],
                preferred_element_type=jnp.float32)
    out_ref[...] = (y + b_ref[...]).astype(out_ref.dtype)


def separable_conv2d_bn(x_nchw, w_merged, bias):
    """SeparableConv2d(C, C, 3, stride=2, padding=1) + BN (inference), NCHW."""
    N, C, H, W = x_nchw.shape
    assert H % 2 == 0 and W % 2 == 0, "feature-pyramid levels assumed even-sized"
    Ho, Wo = H // 2, W // 2

    # NHWC + zero padding (padding=1).
    xp = jnp.pad(jnp.transpose(x_nchw, (0, 2, 3, 1)),
                 ((0, 0), (1, 1), (1, 1), (0, 0)))             # (N, H+2, W+2, C)

    # Parity-phase decomposition of the padded input:
    #   phase(q, p)[n, i, j, c] = xp[n, 2*i + q, 2*j + p, c],  i <= Ho, j <= Wo
    # flattened over (n, i, j) so stride-2 conv taps become contiguous row
    # slices inside the kernel.  Valid outputs are the rows with i<Ho, j<Wo;
    # the helper rows (i==Ho or j==Wo) are computed and discarded below.
    rows = N * (Ho + 1) * (Wo + 1)
    rpad = _round_up(rows + Wo + 2, 8)       # room for the largest tap offset
    phases = [xp[:, q::2, p::2, :].reshape(rows, C)
              for q in (0, 1) for p in (0, 1)]
    xph = jnp.stack(phases, axis=0)                            # (4, rows, C)
    xph = jnp.pad(xph, ((0, 0), (0, rpad - rows), (0, 0)))     # (4, rpad, C)

    kernel = functools.partial(_fused_sepconv_bn_kernel, rows=rows, C=C, Wo=Wo)
    y_flat = pl.pallas_call(
        kernel,
        out_shape=jax.ShapeDtypeStruct((rows, C), x_nchw.dtype),
        grid=(1,),   # whole level fits VMEM; one block => no per-step overhead
        in_specs=[
            pl.BlockSpec((4, rpad, C), lambda i: (0, 0, 0)),
            pl.BlockSpec((9 * C, C), lambda i: (0, 0)),
            pl.BlockSpec((1, C), lambda i: (0, 0)),
        ],
        out_specs=pl.BlockSpec((rows, C), lambda i: (0, 0)),
        scratch_shapes=[pltpu.VMEM((rows, 9 * C), jnp.float32)],
        compiler_params=pltpu.CompilerParams(
            dimension_semantics=("arbitrary",)),
    )(xph, w_merged, bias)
    # TODO(synk): at production sizes, tile the flat row axis across the grid
    # (with a Wo+2-row halo) so v7x's two TensorCores both get work and blocks
    # stay inside its 64 MiB VMEM; also keep the pyramid in NHWC end-to-end to
    # drop the per-level transposes.

    # Drop the i == Ho / j == Wo helper rows and return NCHW.
    y = y_flat.reshape(N, Ho + 1, Wo + 1, C)[:, :Ho, :Wo, :]
    return jnp.transpose(y, (0, 3, 1, 2))


# ----------------------------------------------------------------------------
# Parameters (deterministic init) and the host-side weight fold.
# ----------------------------------------------------------------------------
def init_separable_conv_params(key, channels):
    k1, k2, k3, k4 = jax.random.split(key, 4)
    return dict(
        dw=jax.random.normal(k1, (3, 3, channels), jnp.float32) * 0.1,      # (kh,kw,C)
        pw=jax.random.normal(k2, (channels, channels), jnp.float32) * 0.1,  # (Cin,Cout)
        gamma=1.0 + 0.1 * jax.random.normal(k3, (channels,), jnp.float32),
        beta=0.1 * jax.random.normal(k4, (channels,), jnp.float32),
        running_mean=jnp.zeros((channels,), jnp.float32),
        running_var=jnp.ones((channels,), jnp.float32),
        eps=1e-5,
    )


def fold_separable_conv_params(p):
    """Merge depthwise, pointwise and BN scale into one (9*C, C) weight + bias."""
    C = p["pw"].shape[0]
    scale = p["gamma"] / jnp.sqrt(p["running_var"] + p["eps"])       # (C,)
    bias = p["beta"] - p["running_mean"] * scale                     # (C,)
    pw_scaled = p["pw"] * scale[None, :]                             # (Cin, Cout)
    w = p["dw"].reshape(9, C)[:, :, None] * pw_scaled[None, :, :]    # (9, Cin, Cout)
    return w.reshape(9 * C, C), bias.reshape(1, C)


def multiscale_fusion(multiscale_x_nchw, params_list):
    """Matches MultiscaleFusion.forward; inputs/outputs are NCHW like PyTorch."""
    folded = [fold_separable_conv_params(p) for p in params_list]
    output = [multiscale_x_nchw[0]]
    for i, (w, b) in enumerate(folded):
        y = separable_conv2d_bn(multiscale_x_nchw[i], w, b)
        output.append(jnp.concatenate([multiscale_x_nchw[i + 1], y], axis=1))
    return output


# ----------------------------------------------------------------------------
# Pure-JAX reference (NCHW, lax convs, unfused params) for a correctness check.
# ----------------------------------------------------------------------------
def _sepconv_bn_ref_nchw(x_nchw, p):
    C = x_nchw.shape[1]
    dw_oihw = jnp.transpose(p["dw"], (2, 0, 1))[:, None, :, :]
    y = lax.conv_general_dilated(
        x_nchw, dw_oihw, window_strides=(2, 2), padding=((1, 1), (1, 1)),
        dimension_numbers=("NCHW", "OIHW", "NCHW"), feature_group_count=C,
        precision=lax.Precision.HIGHEST)
    pw_oihw = jnp.transpose(p["pw"], (1, 0))[:, :, None, None]
    y = lax.conv_general_dilated(
        y, pw_oihw, window_strides=(1, 1), padding=((0, 0), (0, 0)),
        dimension_numbers=("NCHW", "OIHW", "NCHW"),
        precision=lax.Precision.HIGHEST)
    scale = p["gamma"] / jnp.sqrt(p["running_var"] + p["eps"])
    bias = p["beta"] - p["running_mean"] * scale
    return y * scale.reshape(1, C, 1, 1) + bias.reshape(1, C, 1, 1)


def multiscale_fusion_ref(multiscale_x_nchw, params_list):
    output = [multiscale_x_nchw[0]]
    for i, p in enumerate(params_list):
        y = _sepconv_bn_ref_nchw(multiscale_x_nchw[i], p)
        output.append(jnp.concatenate([multiscale_x_nchw[i + 1], y], axis=1))
    return output


if __name__ == "__main__":
    key = jax.random.PRNGKey(0)
    in_channels_list = [4, 8, 16]
    batch, spatial0 = 2, 16

    # feature pyramid: each level halves the spatial size
    xs = []
    for lvl, c in enumerate(in_channels_list):
        key, sub = jax.random.split(key)
        s = spatial0 // (2 ** lvl)
        xs.append(jax.random.normal(sub, (batch, c, s, s), jnp.float32))

    # one SeparableConv2d per adjacent level pair (operates on level i's channels)
    params_list = []
    for i in range(1, len(in_channels_list)):
        key, sub = jax.random.split(key)
        params_list.append(init_separable_conv_params(sub, in_channels_list[i - 1]))

    outs = multiscale_fusion(xs, params_list)
    outs = [jax.block_until_ready(o) for o in outs]

    # sanity check vs pure-JAX reference
    refs = multiscale_fusion_ref(xs, params_list)
    for o, r in zip(outs, refs):
        np.testing.assert_allclose(np.asarray(o), np.asarray(r), rtol=1e-3, atol=1e-3)

    print("KERNEL_OK")
</pallas_src>

<mosaic_0001>
module attributes {stable_mosaic.version = 11 : i64} {
  func.func @_fused_sepconv_bn_kernel(%arg0: i32, %arg1: memref<4x176x4xf32, #tpu.memory_space<vmem>>, %arg2: memref<36x4xf32, #tpu.memory_space<vmem>>, %arg3: memref<1x4xf32, #tpu.memory_space<vmem>>, %arg4: memref<162x4xf32, #tpu.memory_space<vmem>>, %arg5: memref<162x36xf32, #tpu.memory_space<vmem>>) attributes {dimension_semantics = [#tpu.dimension_semantics<arbitrary>], iteration_bounds = array<i64: 1>, scalar_prefetch = 0 : i64, scratch_operands = 1 : i64, tpu.core_type = #tpu.core_type<tc>, window_params = [{pipeline_mode = #tpu.pipeline_mode<synchronous>, transform_indices = @transform_0, window_bounds = array<i64: 4, 176, 4>}, {pipeline_mode = #tpu.pipeline_mode<synchronous>, transform_indices = @transform_1, window_bounds = array<i64: 36, 4>}, {pipeline_mode = #tpu.pipeline_mode<synchronous>, transform_indices = @transform_2, window_bounds = array<i64: 1, 4>}, {pipeline_mode = #tpu.pipeline_mode<synchronous>, transform_indices = @transform_3, window_bounds = array<i64: 162, 4>}]} {
    %c0 = arith.constant 0 : index
    %c0_0 = arith.constant 0 : index
    %c0_1 = arith.constant 0 : index
    %0 = vector.load %arg1[%c0, %c0_0, %c0_1] : memref<4x176x4xf32, #tpu.memory_space<vmem>>, vector<4x176x4xf32>
    %1 = vector.extract_strided_slice %0 {offsets = [0, 0, 0], sizes = [1, 162, 4], strides = [1, 1, 1]} : vector<4x176x4xf32> to vector<1x162x4xf32>
    %2 = vector.shape_cast %1 : vector<1x162x4xf32> to vector<162x4xf32>
    %c0_2 = arith.constant 0 : index
    %c0_3 = arith.constant 0 : index
    %3 = vector.load %arg5[%c0_2, %c0_3] : memref<162x36xf32, #tpu.memory_space<vmem>>, vector<162x4xf32>
    tpu.vector_store %arg5[%c0_2, %c0_3], %2 {strides = array<i32>} : memref<162x36xf32, #tpu.memory_space<vmem>>, vector<162x4xf32>,
    %4 = vector.extract_strided_slice %0 {offsets = [1, 0, 0], sizes = [1, 162, 4], strides = [1, 1, 1]} : vector<4x176x4xf32> to vector<1x162x4xf32>
    %5 = vector.shape_cast %4 : vector<1x162x4xf32> to vector<162x4xf32>
    %c0_4 = arith.constant 0 : index
    %c4 = arith.constant 4 : index
    %6 = vector.load %arg5[%c0_4, %c4] : memref<162x36xf32, #tpu.memory_space<vmem>>, vector<162x4xf32>
    tpu.vector_store %arg5[%c0_4, %c4], %5 {strides = array<i32>} : memref<162x36xf32, #tpu.memory_space<vmem>>, vector<162x4xf32>,
    %7 = vector.extract_strided_slice %0 {offsets = [0, 1, 0], sizes = [1, 162, 4], strides = [1, 1, 1]} : vector<4x176x4xf32> to vector<1x162x4xf32>
    %8 = vector.shape_cast %7 : vector<1x162x4xf32> to vector<162x4xf32>
    %c0_5 = arith.constant 0 : index
    %c8 = arith.constant 8 : index
    %9 = vector.load %arg5[%c0_5, %c8] : memref<162x36xf32, #tpu.memory_space<vmem>>, vector<162x4xf32>
    tpu.vector_store %arg5[%c0_5, %c8], %8 {strides = array<i32>} : memref<162x36xf32, #tpu.memory_space<vmem>>, vector<162x4xf32>,
    %10 = vector.extract_strided_slice %0 {offsets = [2, 0, 0], sizes = [1, 162, 4], strides = [1, 1, 1]} : vector<4x176x4xf32> to vector<1x162x4xf32>
    %11 = vector.shape_cast %10 : vector<1x162x4xf32> to vector<162x4xf32>
    %c0_6 = arith.constant 0 : index
    %c12 = arith.constant 12 : index
    %12 = vector.load %arg5[%c0_6, %c12] : memref<162x36xf32, #tpu.memory_space<vmem>>, vector<162x4xf32>
    tpu.vector_store %arg5[%c0_6, %c12], %11 {strides = array<i32>} : memref<162x36xf32, #tpu.memory_space<vmem>>, vector<162x4xf32>,
    %13 = vector.extract_strided_slice %0 {offsets = [3, 0, 0], sizes = [1, 162, 4], strides = [1, 1, 1]} : vector<4x176x4xf32> to vector<1x162x4xf32>
    %14 = vector.shape_cast %13 : vector<1x162x4xf32> to vector<162x4xf32>
    %c0_7 = arith.constant 0 : index
    %c16 = arith.constant 16 : index
    %15 = vector.load %arg5[%c0_7, %c16] : memref<162x36xf32, #tpu.memory_space<vmem>>, vector<162x4xf32>
    tpu.vector_store %arg5[%c0_7, %c16], %14 {strides = array<i32>} : memref<162x36xf32, #tpu.memory_space<vmem>>, vector<162x4xf32>,
    %16 = vector.extract_strided_slice %0 {offsets = [2, 1, 0], sizes = [1, 162, 4], strides = [1, 1, 1]} : vector<4x176x4xf32> to vector<1x162x4xf32>
    %17 = vector.shape_cast %16 : vector<1x162x4xf32> to vector<162x4xf32>
    %c0_8 = arith.constant 0 : index
    %c20 = arith.constant 20 : index
    %18 = vector.load %arg5[%c0_8, %c20] : memref<162x36xf32, #tpu.memory_space<vmem>>, vector<162x4xf32>
    tpu.vector_store %arg5[%c0_8, %c20], %17 {strides = array<i32>} : memref<162x36xf32, #tpu.memory_space<vmem>>, vector<162x4xf32>,
    %19 = vector.extract_strided_slice %0 {offsets = [0, 9, 0], sizes = [1, 162, 4], strides = [1, 1, 1]} : vector<4x176x4xf32> to vector<1x162x4xf32>
    %20 = vector.shape_cast %19 : vector<1x162x4xf32> to vector<162x4xf32>
    %c0_9 = arith.constant 0 : index
    %c24 = arith.constant 24 : index
    %21 = vector.load %arg5[%c0_9, %c24] : memref<162x36xf32, #tpu.memory_space<vmem>>, vector<162x4xf32>
    tpu.vector_store %arg5[%c0_9, %c24], %20 {strides = array<i32>} : memref<162x36xf32, #tpu.memory_space<vmem>>, vector<162x4xf32>,
    %22 = vector.extract_strided_slice %0 {offsets = [1, 9, 0], sizes = [1, 162, 4], strides = [1, 1, 1]} : vector<4x176x4xf32> to vector<1x162x4xf32>
    %23 = vector.shape_cast %22 : vector<1x162x4xf32> to vector<162x4xf32>
    %c0_10 = arith.constant 0 : index
    %c28 = arith.constant 28 : index
    %24 = vector.load %arg5[%c0_10, %c28] : memref<162x36xf32, #tpu.memory_space<vmem>>, vector<162x4xf32>
    tpu.vector_store %arg5[%c0_10, %c28], %23 {strides = array<i32>} : memref<162x36xf32, #tpu.memory_space<vmem>>, vector<162x4xf32>,
    %25 = vector.extract_strided_slice %0 {offsets = [0, 10, 0], sizes = [1, 162, 4], strides = [1, 1, 1]} : vector<4x176x4xf32> to vector<1x162x4xf32>
    %26 = vector.shape_cast %25 : vector<1x162x4xf32> to vector<162x4xf32>
    %c0_11 = arith.constant 0 : index
    %c32 = arith.constant 32 : index
    %27 = vector.load %arg5[%c0_11, %c32] : memref<162x36xf32, #tpu.memory_space<vmem>>, vector<162x4xf32>
    tpu.vector_store %arg5[%c0_11, %c32], %26 {strides = array<i32>} : memref<162x36xf32, #tpu.memory_space<vmem>>, vector<162x4xf32>,
    %c0_12 = arith.constant 0 : index
    %c0_13 = arith.constant 0 : index
    %28 = vector.load %arg5[%c0_12, %c0_13] : memref<162x36xf32, #tpu.memory_space<vmem>>, vector<162x36xf32>
    %c0_14 = arith.constant 0 : index
    %c0_15 = arith.constant 0 : index
    %29 = vector.load %arg2[%c0_14, %c0_15] : memref<36x4xf32, #tpu.memory_space<vmem>>, vector<36x4xf32>
    %cst = arith.constant dense<0.000000e+00> : vector<162x4xf32>
    %30 = tpu.matmul %28, %29, %cst {dimension_numbers = #tpu.dot_dimension_numbers<[1], [0], [0], [1], [0, 0, 1, 1], [], []>} : vector<162x36xf32>, vector<36x4xf32>, vector<162x4xf32> -> vector<162x4xf32>
    %c0_16 = arith.constant 0 : index
    %c0_17 = arith.constant 0 : index
    %31 = vector.load %arg3[%c0_16, %c0_17] : memref<1x4xf32, #tpu.memory_space<vmem>>, vector<1x4xf32>
    %32 = vector.broadcast %31 : vector<1x4xf32> to vector<162x4xf32>
    %33 = arith.addf %30, %32 : vector<162x4xf32>
    %c0_18 = arith.constant 0 : index
    %c0_19 = arith.constant 0 : index
    %34 = vector.load %arg4[%c0_18, %c0_19] : memref<162x4xf32, #tpu.memory_space<vmem>>, vector<162x4xf32>
    tpu.vector_store %arg4[%c0_18, %c0_19], %33 {strides = array<i32>} : memref<162x4xf32, #tpu.memory_space<vmem>>, vector<162x4xf32>,
    return
  }
  func.func @transform_0(%arg0: i32) -> (i32, i32, i32) {
    %c0_i32 = arith.constant 0 : i32
    %c0_i32_0 = arith.constant 0 : i32
    %c0_i32_1 = arith.constant 0 : i32
    %c0_i32_2 = arith.constant 0 : i32
    return %c0_i32, %c0_i32_0, %c0_i32_1 : i32, i32, i32
  }
  func.func @transform_1(%arg0: i32) -> (i32, i32) {
    %c0_i32 = arith.constant 0 : i32
    %c0_i32_0 = arith.constant 0 : i32
    %c0_i32_1 = arith.constant 0 : i32
    return %c0_i32, %c0_i32_0 : i32, i32
  }
  func.func @transform_2(%arg0: i32) -> (i32, i32) {
    %c0_i32 = arith.constant 0 : i32
    %c0_i32_0 = arith.constant 0 : i32
    %c0_i32_1 = arith.constant 0 : i32
    return %c0_i32, %c0_i32_0 : i32, i32
  }
  func.func @transform_3(%arg0: i32) -> (i32, i32) {
    %c0_i32 = arith.constant 0 : i32
    %c0_i32_0 = arith.constant 0 : i32
    %c0_i32_1 = arith.constant 0 : i32
    return %c0_i32, %c0_i32_0 : i32, i32
  }
}

</mosaic_0001>

<bundles_post_ra>
// kernel: tpu_custom_call.1
= control target key start
LH: loop header
LB: loop body
LE: loop exit
PB: predicated region body
PF: predicated region fallthrough
CT: control target
= control target key end

     0   :  { %vm100_vm0 = vcmask 31744   ;;  %s1343_s16 = smov 4   ;;  %s1344_s14 = smov 8   ;;  %v1350_v39 = vmov 0.0|0.0   ;;  %vm999_vm1 = vcmask 1043456   ;;  %v1351_v51 = vmov 0.0   ;;  %s2370_s0 = inlined_call_operand.vmem [shape: f32[4,176,4], index: 0, kind: input, shape index: {}]   ;;  %s2371_s1 = inlined_call_operand.vmem [shape: f32[36,4], index: 1, kind: input, shape index: {}]   ;;  %s2372_s2 = inlined_call_operand.vmem [shape: f32[1,4], index: 2, kind: input, shape index: {}]   ;;  %s2373_s3 = inlined_call_operand.vmem [shape: f32[162,4], index: 3, kind: output, shape index: {}]  }
   0x1   :  { %v1377_v0 = vld [vmem:[%s2370_s0 + $0xc0] sm:$0xff]  ;;  %v36_v1 = vld [vmem:[%s2370_s0 + $0xb0] sm:$0xff]  ;;  %v1388_v2 = vld [vmem:[%s2370_s0 + $0xc8] sm:$0xff]  ;;  %s1345_s30 = smov 12   ;;  %s1346_s8 = smov 16   ;;  %1320 = vmatprep.subr.bf16.mxu0 %v1350_v39  ;;  %1326 = vmatprep.subr.bf16.mxu1 %v1350_v39  ;;  %vm1352_vm2 = vmmov 0  }
   0x2   :  { %148 = vrot.lane.b32.xlu1 %v1377_v0, %s1343_s16  ;;  %144 = vrot.lane.b32.xlu0 %v36_v1, %s1343_s16  ;;  %v1393_v3 = vld [vmem:[%s2370_s0 + $0xb8] sm:$0xff]  ;;  %v14_v4 = vld [vmem:[%s2370_s0] sm:$0xff]  ;;  %s1347_s23 = smov 20   ;;  %s1348_s28 = smov 24   ;;  %vm207_vm3 = vcmask 64544   ;;  %vm314_vm4 = vcmask 97345  }
   0x3   :  { %v1401_v5 = vld [vmem:[%s2370_s0 + $0x8] sm:$0xff]  ;;  %v1406_v6 = vld [vmem:[%s2370_s0 + $0x10] sm:$0xff]  ;;  %101 = vst.msk [vmem:[#allocation2] sm:$0xff] %vm100_vm0, %v14_v4  ;;  %v1425_v8 = vld [vmem:[%s2370_s0 + $0x18] sm:$0xff]  ;;  %s1349_s18 = smov 28   ;;  %1257 = vmatprep.mubr.msk.f32.mxu0 %vm1352_vm2, %v1351_v51  ;;  %1290 = vmatprep.mubr.msk.f32.mxu1 %vm1352_vm2, %v1351_v51  ;;  %vm316_vm5 = vcmask 97344  }
   0x4   :  { %102 = vst.msk [vmem:[#allocation2 + $0x8] sm:$0xff] %vm100_vm0, %v1401_v5  ;;  %103 = vst.msk [vmem:[#allocation2 + $0x10] sm:$0xff] %vm100_vm0, %v1406_v6  ;;  %v1420_v7 = vld [vmem:[%s2370_s0 + $0xd0] sm:$0xff]  ;;  %v1432_v9 = vld [vmem:[%s2370_s0 + $0x48] sm:$0xff]  ;;  %vm422_vm6 = vcmask 130144   ;;  %vm529_vm7 = vcmask 162944  }
   0x5   :  { %104 = vst.msk [vmem:[#allocation2 + $0x18] sm:$0xff] %vm100_vm0, %v1425_v8  ;;  %v1437_v10 = vld [vmem:[%s2370_s0 + $0x50] sm:$0xff]  ;;  %v1442_v11 = vld [vmem:[%s2370_s0 + $0x58] sm:$0xff]  ;;  %110 = vst.msk [vmem:[#allocation2 + $0x48] sm:$0xff] %vm100_vm0, %v1432_v9  ;;  %vm615_vm8 = vcmask 195745   ;;  %vm617_vm9 = vcmask 195744  }
   0x6   :  { %150 = vrot.lane.b32.xlu1 %v1388_v2, %s1343_s16  ;;  %146 = vrot.lane.b32.xlu0 %v1393_v3, %s1343_s16  ;;  %111 = vst.msk [vmem:[#allocation2 + $0x50] sm:$0xff] %vm100_vm0, %v1437_v10  ;;  %112 = vst.msk [vmem:[#allocation2 + $0x58] sm:$0xff] %vm100_vm0, %v1442_v11  ;;  %v1453_v12 = vld [vmem:[%s2370_s0 + $0x60] sm:$0xff]  ;;  %v1458_v13 = vld [vmem:[%s2370_s0 + $0x68] sm:$0xff]  ;;  %vm703_vm10 = vcmask 228545   ;;  %vm705_vm11 = vcmask 228544  }
   0x7   :  { %113 = vst.msk [vmem:[#allocation2 + $0x60] sm:$0xff] %vm100_vm0, %v1453_v12  ;;  %114 = vst.msk [vmem:[#allocation2 + $0x68] sm:$0xff] %vm100_vm0, %v1458_v13  ;;  %v1470_v14 = vld [vmem:[%s2370_s0 + $0x20] sm:$0xff]  ;;  %v1481_v15 = vld [vmem:[%s2370_s0 + $0x70] sm:$0xff]  ;;  %vm791_vm12 = vcmask 261345   ;;  %vm793_vm13 = vcmask 261344  }
   0x8   :  { %105 = vst.msk [vmem:[#allocation2 + $0x20] sm:$0xff] %vm100_vm0, %v1470_v14  ;;  %v58_v16 = vld [vmem:[%s2370_s0 + $0x160] sm:$0xff]  ;;  %v59_v17 = vld [vmem:[%s2370_s0 + $0x168] sm:$0xff]  ;;  %115 = vst.msk [vmem:[#allocation2 + $0x70] sm:$0xff] %vm100_vm0, %v1481_v15  ;;  %vm878_vm14 = vcmask 294146   ;;  %vm880_vm15 = vcmask 294144  }
   0x9   :  { %v1494_v18 = vld [vmem:[%s2370_s0 + $0x28] sm:$0xff]  ;;  %v1501_v19 = vld [vmem:[%s2370_s0 + $0x78] sm:$0xff]  ;;  %v1506_v20 = vld [vmem:[%s2370_s0 + $0x40] sm:$0xff] }
   0xa   :  { %152 = vrot.lane.b32.xlu0 %v1420_v7, %s1343_s16  ;;  %251 = vrot.lane.b32.xlu1 %v14_v4, %s1344_s14  ;;  %106 = vst.msk [vmem:[#allocation2 + $0x28] sm:$0xff] %vm100_vm0, %v1494_v18  ;;  %116 = vst.msk [vmem:[#allocation2 + $0x78] sm:$0xff] %vm100_vm0, %v1501_v19  ;;  %v79_v21 = vld [vmem:[%s2370_s0 + $0x210] sm:$0xff]  ;;  %v80_v22 = vld [vmem:[%s2370_s0 + $0x218] sm:$0xff] }
   0xb   :  { %109 = vst.msk [vmem:[#allocation2 + $0x40] sm:$0xff] %vm100_vm0, %v1506_v20  ;;  %v1525_v23 = vld [vmem:[%s2370_s0 + $0xf0] sm:$0xff]  ;;  %v1530_v24 = vld [vmem:[%s2370_s0 + $0xf8] sm:$0xff]  ;;  %v1539_v25 = vld [vmem:[%s2370_s0 + $0x100] sm:$0xff] }
   0xc   :  { %v1544_v26 = vld [vmem:[%s2370_s0 + $0x108] sm:$0xff]  ;;  %v1553_v27 = vld [vmem:[%s2370_s0 + $0x110] sm:$0xff]  ;;  %v1558_v28 = vld [vmem:[%s2370_s0 + $0x118] sm:$0xff] }
   0xd   :  { %v1569_v29 = vld [vmem:[%s2370_s0 + $0x30] sm:$0xff]  ;;  %v1574_v30 = vld [vmem:[%s2370_s0 + $0x80] sm:$0xff]  ;;  %v1602_v32 = vld [vmem:[%s2370_s0 + $0x1a8] sm:$0xff] }
   0xe   :  { %253 = vrot.lane.b32.xlu0 %v1401_v5, %s1344_s14  ;;  %255 = vrot.lane.b32.xlu1 %v1406_v6, %s1344_s14  ;;  %107 = vst.msk [vmem:[#allocation2 + $0x30] sm:$0xff] %vm100_vm0, %v1569_v29  ;;  %117 = vst.msk [vmem:[#allocation2 + $0x80] sm:$0xff] %vm100_vm0, %v1574_v30  ;;  %v60_v31 = vld [vmem:[%s2370_s0 + $0x170] sm:$0xff]  ;;  %v69_v34 = vld [vmem:[%s2370_s0 + $0x1b8] sm:$0xff] }
   0xf   :  { %v68_v33 = vld [vmem:[%s2370_s0 + $0x1b0] sm:$0xff]  ;;  %v70_v35 = vld [vmem:[%s2370_s0 + $0x1c0] sm:$0xff]  ;;  %v924_v37 = vld [vmem:[%s2371_s1 + $0x8] sm:$0xff] }
  0x10   :  { %v923_v36 = vld [vmem:[%s2371_s1] sm:$0xff]  ;;  %v925_v41 = vld [vmem:[%s2371_s1 + $0x10] sm:$0xff]  ;;  %v926_v42 = vld [vmem:[%s2371_s1 + $0x18] sm:$0xff] }
  0x11   :  { %v81_v38 = vld [vmem:[%s2370_s0 + $0x220] sm:$0xff]  ;;  %v1321_v40 = vpack.c.bf16 %v924_v37, %v923_v36  ;;  %v1324_v43 = vpack.c.bf16 %v926_v42, %v925_v41  ;;  %v88_v44 = vld [vmem:[%s2370_s0 + $0x258] sm:$0xff]  ;;  %v1653_v47 = vld [vmem:[%s2370_s0 + $0x88] sm:$0xff] }
  0x12   :  { %359 = vrot.lane.b32.xlu0 %v58_v16, %s1345_s30  ;;  %361 = vrot.lane.b32.xlu1 %v59_v17, %s1345_s30  ;;  %v89_v45 = vld [vmem:[%s2370_s0 + $0x260] sm:$0xff]  ;;  %v1648_v46 = vld [vmem:[%s2370_s0 + $0x38] sm:$0xff]  ;;  %118 = vst.msk [vmem:[#allocation2 + $0x88] sm:$0xff] %vm100_vm0, %v1653_v47 }
  0x13   :  { %1322 = vmatpush3.bf16.msra.mxu0 %v1321_v40  ;;  %1329 = vmatpush3.bf16.msra.mxu1 %v1321_v40  ;;  %108 = vst.msk [vmem:[#allocation2 + $0x38] sm:$0xff] %vm100_vm0, %v1648_v46  ;;  %v927_v48 = vld [vmem:[%s2371_s1 + $0x20] sm:$0xf]  ;;  %v90_v49 = vld [vmem:[%s2370_s0 + $0x268] sm:$0xff]  ;;  %v91_v50 = vld [vmem:[%s2370_s0 + $0x270] sm:$0xff]  ;;  %s1353_s1 = smov 32  }
  0x14   :  { %1323 = vmatprep.subr.bf16.mxu0 %v1350_v39  ;;  %1327 = vmatprep.subr.bf16.mxu1 %v1350_v39  ;;  %v1685_v52 = vld [vmem:[%s2370_s0 + $0x120] sm:$0xff]  ;;  %v61_v53 = vld [vmem:[%s2370_s0 + $0x178] sm:$0xff]  ;;  %v1709_v54 = vld [vmem:[%s2370_s0 + $0x90] sm:$0xff] }
  0x15   :  { %119 = vst.msk [vmem:[#allocation2 + $0x90] sm:$0xff] %vm100_vm0, %v1709_v54  ;;  %v71_v55 = vld [vmem:[%s2370_s0 + $0x1c8] sm:$0xff]  ;;  %v92_v59 = vld [vmem:[%s2370_s0 + $0x278] sm:$0xff]  ;;  %v1820_v37 = vld [vmem:[%s2370_s0 + $0xe0] sm:$0xff] }
  0x16   :  { %466 = vrot.lane.b32.xlu0 %v79_v21, %s1346_s8  ;;  %468 = vrot.lane.b32.xlu1 %v80_v22, %s1346_s8  ;;  %v82_v56 = vld [vmem:[%s2370_s0 + $0x228] sm:$0xff]  ;;  %v72_v21 = vld [vmem:[%s2370_s0 + $0x1d0] sm:$0xff] }
  0x17   :  { %1325 = vmatpush3.bf16.msra.mxu0 %v1324_v43  ;;  %1330 = vmatpush3.bf16.msra.mxu1 %v1324_v43  ;;  %v1755_v1 = vld [vmem:[%s2370_s0 + $0x128] sm:$0xff] }
  0x18   :  { %1255 = vmatprep.subr.mxu0 %v1351_v51  ;;  %1328 = vmatprep.subr.mxu1 %v1351_v51 }
  0x1a   :  { %160 = vrot.lane.b32.xlu0 %v1525_v23, %s1343_s16  ;;  %162 = vrot.lane.b32.xlu1 %v1530_v24, %s1343_s16 }
  0x1b   :  { %1256 = vmatpush3.msk.msra.mxu0 %vm999_vm1, %v927_v48  ;;  %1331 = vmatpush3.msk.msra.mxu1 %vm999_vm1, %v927_v48  ;;  %v73_v48 = vld [vmem:[%s2370_s0 + $0x1d8] sm:$0xff]  ;;  %vm935_vm1 = vcmask 293888  }
  0x1e   :  { %164 = vrot.lane.b32.xlu0 %v1539_v25, %s1343_s16  ;;  %166 = vrot.lane.b32.xlu1 %v1544_v26, %s1343_s16 }
  0x22   :  { %168 = vrot.lane.b32.xlu0 %v1553_v27, %s1343_s16  ;;  %170 = vrot.lane.b32.xlu1 %v1558_v28, %s1343_s16 }
  0x26   :  { %552 = vrot.lane.b32.xlu0 %v58_v16, %s1347_s23  ;;  %554 = vrot.lane.b32.xlu1 %v59_v17, %s1347_s23  ;;  %v62_v17 = vld [vmem:[%s2370_s0 + $0x180] sm:$0xff] }
  0x2a   :  { %257 = vrot.lane.b32.xlu0 %v1425_v8, %s1344_s14  ;;  %269 = vrot.lane.b32.xlu1 %v1432_v9, %s1344_s14 }
  0x2e   :  { %271 = vrot.lane.b32.xlu0 %v1437_v10, %s1344_s14  ;;  %273 = vrot.lane.b32.xlu1 %v1442_v11, %s1344_s14 }
  0x32   :  { %275 = vrot.lane.b32.xlu0 %v1453_v12, %s1344_s14  ;;  %277 = vrot.lane.b32.xlu1 %v1458_v13, %s1344_s14 }
  0x36   :  { %640 = vrot.lane.b32.xlu0 %v1401_v5, %s1348_s28  ;;  %642 = vrot.lane.b32.xlu1 %v1406_v6, %s1348_s28 }
  0x3a   :  { %363 = vrot.lane.b32.xlu0 %v60_v31, %s1345_s30  ;;  %377 = vrot.lane.b32.xlu1 %v1602_v32, %s1345_s30 }
  0x3e   :  { %379 = vrot.lane.b32.xlu0 %v68_v33, %s1345_s30  ;;  %381 = vrot.lane.b32.xlu1 %v69_v34, %s1345_s30 }
  0x42   :  { %383 = vrot.lane.b32.xlu0 %v70_v35, %s1345_s30  ;;  %728 = vrot.lane.b32.xlu1 %v1393_v3, %s1349_s18 }
  0x46   :  { %730 = vrot.lane.b32.xlu0 %v1377_v0, %s1349_s18  ;;  %470 = vrot.lane.b32.xlu1 %v81_v38, %s1346_s8  ;;  %v1750_v0 = vld [vmem:[%s2370_s0 + $0xd8] sm:$0xff]  ;;  %v1825_v38 = vld [vmem:[%s2370_s0 + $0x130] sm:$0xff] }
  0x4a   :  { %484 = vrot.lane.b32.xlu0 %v88_v44, %s1346_s8  ;;  %486 = vrot.lane.b32.xlu1 %v89_v45, %s1346_s8  ;;  %v63_v45 = vld [vmem:[%s2370_s0 + $0x188] sm:$0xff] }
  0x4e   :  { %488 = vrot.lane.b32.xlu0 %v90_v49, %s1346_s8  ;;  %490 = vrot.lane.b32.xlu1 %v91_v50, %s1346_s8 }
  0x52   :  { %815 = vrot.lane.b32.xlu0 %v1401_v5, %s1353_s1  ;;  %817 = vrot.lane.b32.xlu1 %v1406_v6, %s1353_s1  ;;  %v1768_v6 = vld [vmem:[%s2370_s0 + $0x98] sm:$0xff] }
  0x53   :  { %120 = vst.msk [vmem:[#allocation2 + $0x98] sm:$0xff] %vm100_vm0, %v1768_v6 }
  0x56   :  { %172 = vrot.lane.b32.xlu0 %v1685_v52, %s1343_s16  ;;  %556 = vrot.lane.b32.xlu1 %v60_v31, %s1347_s23  ;;  %v83_v31 = vld [vmem:[%s2370_s0 + $0x230] sm:$0xff] }
  0x5a   :  { %572 = vrot.lane.b32.xlu0 %v68_v33, %s1347_s23  ;;  %574 = vrot.lane.b32.xlu1 %v69_v34, %s1347_s23  ;;  %v93_v33 = vld [vmem:[%s2370_s0 + $0x280] sm:$0xff] }
  0x5e   :  { %576 = vrot.lane.b32.xlu0 %v70_v35, %s1347_s23  ;;  %259 = vrot.lane.b32.xlu1 %v1470_v14, %s1344_s14 }
  0x62   :  { %279 = vrot.lane.b32.xlu0 %v1481_v15, %s1344_s14  ;;  %644 = vrot.lane.b32.xlu1 %v1425_v8, %s1348_s28 }
  0x66   :  { %660 = vrot.lane.b32.xlu0 %v1442_v11, %s1348_s28  ;;  %662 = vrot.lane.b32.xlu1 %v1453_v12, %s1348_s28 }
  0x6a   :  { %664 = vrot.lane.b32.xlu0 %v1458_v13, %s1348_s28  ;;  %365 = vrot.lane.b32.xlu1 %v61_v53, %s1345_s30 }
  0x6e   :  { %385 = vrot.lane.b32.xlu0 %v71_v55, %s1345_s30  ;;  %732 = vrot.lane.b32.xlu1 %v1388_v2, %s1349_s18 }
  0x72   :  { %748 = vrot.lane.b32.xlu0 %v1544_v26, %s1349_s18  ;;  %750 = vrot.lane.b32.xlu1 %v1553_v27, %s1349_s18 }
  0x74   :  { %v149_v57 = vpop.permute.xlu1 %148  ;;  %v145_v58 = vpop.permute.xlu0 %144 }
  0x75   :  { %210 = vst.msk [vmem:[#allocation2 + $0x10] sm:$0xff] %vm207_vm3, %v149_v57  ;;  %208 = vst.msk [vmem:[#allocation2] sm:$0xff] %vm207_vm3, %v145_v58 }
  0x76   :  { %752 = vrot.lane.b32.xlu0 %v1558_v28, %s1349_s18  ;;  %472 = vrot.lane.b32.xlu1 %v82_v56, %s1346_s8  ;;  %v94_v56 = vld [vmem:[%s2370_s0 + $0x288] sm:$0xff] }
  0x78   :  { %v151_v60 = vpop.permute.xlu1 %150  ;;  %v147_v61 = vpop.permute.xlu0 %146 }
  0x79   :  { %211 = vst.msk [vmem:[#allocation2 + $0x18] sm:$0xff] %vm207_vm3, %v151_v60  ;;  %209 = vst.msk [vmem:[#allocation2 + $0x8] sm:$0xff] %vm207_vm3, %v147_v61  ;;  %v1882_v61 = vld [vmem:[%s2370_s0 + $0xe8] sm:$0xff] }
  0x7a   :  { %492 = vrot.lane.b32.xlu0 %v92_v59, %s1346_s8  ;;  %819 = vrot.lane.b32.xlu1 %v1425_v8, %s1353_s1 }
  0x7c   :  { %v153_v62 = vpop.permute.xlu0 %152  ;;  %v252_v63 = vpop.permute.xlu1 %251 }
  0x7d   :  { %212 = vst.msk [vmem:[#allocation2 + $0x20] sm:$0xff] %vm207_vm3, %v153_v62  ;;  %v1887_v62 = vld [vmem:[%s2370_s0 + $0x138] sm:$0xff] }
  0x7e   :  { %315 = vst.msk [vmem:[#allocation2 - $0x1] sm:$0xfe] %vm314_vm4, %v252_v63  ;;  %837 = vrot.lane.b32.xlu0 %v1453_v12, %s1353_s1  ;;  %839 = vrot.lane.b32.xlu1 %v1458_v13, %s1353_s1  ;;  %vm121_vm4 = vcmask 25600  }
  0x80   :  { %v254_v2 = vpop.permute.xlu0 %253  ;;  %v256_v3 = vpop.permute.xlu1 %255 }
  0x81   :  { %317 = vst.msk [vmem:[#allocation2 + $0x7] sm:$0xff] %vm316_vm5, %v254_v2  ;;  %318 = vst.msk [vmem:[#allocation2 + $0xf] sm:$0xff] %vm316_vm5, %v256_v3 }
  0x82   :  { %154 = vrot.lane.b32.xlu0 %v1750_v0, %s1343_s16  ;;  %174 = vrot.lane.b32.xlu1 %v1755_v1, %s1343_s16 }
  0x84   :  { %v360_v4 = vpop.permute.xlu0 %359  ;;  %v362_v5 = vpop.permute.xlu1 %361 }
  0x85   :  { %423 = vst.msk [vmem:[#allocation2] sm:$0xff] %vm422_vm6, %v360_v4  ;;  %424 = vst.msk [vmem:[#allocation2 + $0x8] sm:$0xff] %vm422_vm6, %v362_v5 }
  0x86   :  { %558 = vrot.lane.b32.xlu0 %v61_v53, %s1347_s23  ;;  %578 = vrot.lane.b32.xlu1 %v71_v55, %s1347_s23  ;;  %v84_v55 = vld [vmem:[%s2370_s0 + $0x238] sm:$0xff] }
  0x88   :  { %v467_v8 = vpop.permute.xlu0 %466  ;;  %v469_v12 = vpop.permute.xlu1 %468 }
  0x89   :  { %530 = vst.msk [vmem:[#allocation2] sm:$0xff] %vm529_vm7, %v467_v8  ;;  %531 = vst.msk [vmem:[#allocation2 + $0x8] sm:$0xff] %vm529_vm7, %v469_v12  ;;  %v64_v8 = vld [vmem:[%s2370_s0 + $0x190] sm:$0xff]  ;;  %v74_v12 = vld [vmem:[%s2370_s0 + $0x1e0] sm:$0xff] }
  0x8a   :  { %261 = vrot.lane.b32.xlu0 %v1494_v18, %s1344_s14  ;;  %281 = vrot.lane.b32.xlu1 %v1501_v19, %s1344_s14 }
  0x8c   :  { %v161_v13 = vpop.permute.xlu0 %160  ;;  %v163_v16 = vpop.permute.xlu1 %162 }
  0x8d   :  { %216 = vst.msk [vmem:[#allocation2 + $0x40] sm:$0xff] %vm207_vm3, %v161_v13  ;;  %217 = vst.msk [vmem:[#allocation2 + $0x48] sm:$0xff] %vm207_vm3, %v163_v16 }
  0x8e   :  { %646 = vrot.lane.b32.xlu0 %v1470_v14, %s1348_s28  ;;  %666 = vrot.lane.b32.xlu1 %v1481_v15, %s1348_s28 }
  0x90   :  { %v165_v22 = vpop.permute.xlu0 %164  ;;  %v167_v26 = vpop.permute.xlu1 %166 }
  0x91   :  { %218 = vst.msk [vmem:[#allocation2 + $0x50] sm:$0xff] %vm207_vm3, %v165_v22  ;;  %219 = vst.msk [vmem:[#allocation2 + $0x58] sm:$0xff] %vm207_vm3, %v167_v26  ;;  %v85_v22 = vld [vmem:[%s2370_s0 + $0x240] sm:$0xff]  ;;  %v95_v26 = vld [vmem:[%s2370_s0 + $0x290] sm:$0xff] }
  0x92   :  { %367 = vrot.lane.b32.xlu0 %v62_v17, %s1345_s30  ;;  %387 = vrot.lane.b32.xlu1 %v72_v21, %s1345_s30 }
  0x94   :  { %v169_v27 = vpop.permute.xlu0 %168  ;;  %v171_v28 = vpop.permute.xlu1 %170 }
  0x95   :  { %220 = vst.msk [vmem:[#allocation2 + $0x60] sm:$0xff] %vm207_vm3, %v169_v27  ;;  %221 = vst.msk [vmem:[#allocation2 + $0x68] sm:$0xff] %vm207_vm3, %v171_v28 }
  0x96   :  { %734 = vrot.lane.b32.xlu0 %v1420_v7, %s1349_s18  ;;  %754 = vrot.lane.b32.xlu1 %v1685_v52, %s1349_s18 }
  0x98   :  { %v553_v34 = vpop.permute.xlu0 %552  ;;  %v555_v35 = vpop.permute.xlu1 %554 }
  0x99   :  { %616 = vst.msk [vmem:[#allocation2 - $0x1] sm:$0xfe] %vm615_vm8, %v553_v34  ;;  %v1948_v34 = vld [vmem:[%s2370_s0 + $0x140] sm:$0xff]  ;;  %vm637_vm8 = vcmask 190624  }
  0x9a   :  { %618 = vst.msk [vmem:[#allocation2 + $0x7] sm:$0xff] %vm617_vm9, %v555_v35  ;;  %474 = vrot.lane.b32.xlu0 %v83_v31, %s1346_s8  ;;  %494 = vrot.lane.b32.xlu1 %v93_v33, %s1346_s8 }
  0x9c   :  { %v258_v7 = vpop.permute.xlu0 %257  ;;  %v270_v36 = vpop.permute.xlu1 %269 }
  0x9d   :  { %319 = vst.msk [vmem:[#allocation2 + $0x17] sm:$0xff] %vm316_vm5, %v258_v7  ;;  %325 = vst.msk [vmem:[#allocation2 + $0x47] sm:$0xff] %vm316_vm5, %v270_v36 }
  0x9e   :  { %821 = vrot.lane.b32.xlu0 %v1470_v14, %s1353_s1  ;;  %841 = vrot.lane.b32.xlu1 %v1481_v15, %s1353_s1 }
  0xa0   :  { %v272_v39 = vpop.permute.xlu0 %271  ;;  %v274_v40 = vpop.permute.xlu1 %273 }
  0xa1   :  { %326 = vst.msk [vmem:[#allocation2 + $0x4f] sm:$0xff] %vm316_vm5, %v272_v39  ;;  %327 = vst.msk [vmem:[#allocation2 + $0x57] sm:$0xff] %vm316_vm5, %v274_v40 }
  0xa2   :  { %156 = vrot.lane.b32.xlu0 %v1820_v37, %s1343_s16  ;;  %176 = vrot.lane.b32.xlu1 %v1825_v38, %s1343_s16 }
  0xa4   :  { %v276_v14 = vpop.permute.xlu0 %275  ;;  %v278_v15 = vpop.permute.xlu1 %277 }
  0xa5   :  { %328 = vst.msk [vmem:[#allocation2 + $0x5f] sm:$0xff] %vm316_vm5, %v276_v14  ;;  %329 = vst.msk [vmem:[#allocation2 + $0x67] sm:$0xff] %vm316_vm5, %v278_v15  ;;  %v75_v14 = vld [vmem:[%s2370_s0 + $0x1e8] sm:$0xff] }
  0xa6   :  { %560 = vrot.lane.b32.xlu0 %v62_v17, %s1347_s23  ;;  %580 = vrot.lane.b32.xlu1 %v72_v21, %s1347_s23 }
  0xa8   :  { %v641_v41 = vpop.permute.xlu0 %640  ;;  %v643_v42 = vpop.permute.xlu1 %642 }
  0xa9   :  { %704 = vst.msk [vmem:[#allocation2 - $0x1] sm:$0xfe] %vm703_vm10, %v641_v41  ;;  %vm813_vm10 = vcmask 256224  }
  0xaa   :  { %706 = vst.msk [vmem:[#allocation2 + $0x7] sm:$0xff] %vm705_vm11, %v643_v42  ;;  %263 = vrot.lane.b32.xlu0 %v1569_v29, %s1344_s14  ;;  %283 = vrot.lane.b32.xlu1 %v1574_v30, %s1344_s14  ;;  %v86_v42 = vld [vmem:[%s2370_s0 + $0x248] sm:$0xff] }
  0xac   :  { %v364_v43 = vpop.permute.xlu0 %363  ;;  %v378_v44 = vpop.permute.xlu1 %377 }
  0xad   :  { %425 = vst.msk [vmem:[#allocation2 + $0x10] sm:$0xff] %vm422_vm6, %v364_v43  ;;  %432 = vst.msk [vmem:[#allocation2 + $0x48] sm:$0xff] %vm422_vm6, %v378_v44 }
  0xae   :  { %648 = vrot.lane.b32.xlu0 %v1494_v18, %s1348_s28  ;;  %668 = vrot.lane.b32.xlu1 %v1501_v19, %s1348_s28 }
  0xb0   :  { %v380_v49 = vpop.permute.xlu0 %379  ;;  %v382_v50 = vpop.permute.xlu1 %381 }
  0xb1   :  { %433 = vst.msk [vmem:[#allocation2 + $0x50] sm:$0xff] %vm422_vm6, %v380_v49  ;;  %434 = vst.msk [vmem:[#allocation2 + $0x58] sm:$0xff] %vm422_vm6, %v382_v50 }
  0xb2   :  { %369 = vrot.lane.b32.xlu0 %v63_v45, %s1345_s30  ;;  %389 = vrot.lane.b32.xlu1 %v73_v48, %s1345_s30 }
  0xb4   :  { %v384_v52 = vpop.permute.xlu0 %383  ;;  %v729_v53 = vpop.permute.xlu1 %728 }
  0xb5   :  { %435 = vst.msk [vmem:[#allocation2 + $0x60] sm:$0xff] %vm422_vm6, %v384_v52 }
  0xb6   :  { %792 = vst.msk [vmem:[#allocation2 - $0x1] sm:$0xfe] %vm791_vm12, %v729_v53  ;;  %736 = vrot.lane.b32.xlu0 %v1750_v0, %s1349_s18  ;;  %756 = vrot.lane.b32.xlu1 %v1755_v1, %s1349_s18  ;;  %v2005_v53 = vld [vmem:[%s2370_s0 + $0x148] sm:$0xff] }
  0xb8   :  { %v731_v57 = vpop.permute.xlu0 %730  ;;  %v471_v58 = vpop.permute.xlu1 %470 }
  0xb9   :  { %794 = vst.msk [vmem:[#allocation2 + $0x7] sm:$0xff] %vm793_vm13, %v731_v57 }
  0xba   :  { %532 = vst.msk [vmem:[#allocation2 + $0x10] sm:$0xff] %vm529_vm7, %v471_v58  ;;  %476 = vrot.lane.b32.xlu0 %v84_v55, %s1346_s8  ;;  %496 = vrot.lane.b32.xlu1 %v94_v56, %s1346_s8 }
  0xbc   :  { %v485_v59 = vpop.permute.xlu0 %484  ;;  %v487_v60 = vpop.permute.xlu1 %486 }
  0xbd   :  { %539 = vst.msk [vmem:[#allocation2 + $0x48] sm:$0xff] %vm529_vm7, %v485_v59  ;;  %540 = vst.msk [vmem:[#allocation2 + $0x50] sm:$0xff] %vm529_vm7, %v487_v60 }
  0xbe   :  { %823 = vrot.lane.b32.xlu0 %v1494_v18, %s1353_s1  ;;  %843 = vrot.lane.b32.xlu1 %v1501_v19, %s1353_s1 }
  0xc0   :  { %v489_v63 = vpop.permute.xlu0 %488  ;;  %v491_v0 = vpop.permute.xlu1 %490 }
  0xc1   :  { %541 = vst.msk [vmem:[#allocation2 + $0x58] sm:$0xff] %vm529_vm7, %v489_v63  ;;  %542 = vst.msk [vmem:[#allocation2 + $0x60] sm:$0xff] %vm529_vm7, %v491_v0  ;;  %v2039_v63 = vld [vmem:[%s2370_s0 + $0xa0] sm:$0xff] }
  0xc2   :  { %158 = vrot.lane.b32.xlu0 %v1882_v61, %s1343_s16  ;;  %178 = vrot.lane.b32.xlu1 %v1887_v62, %s1343_s16  ;;  %122 = vst.msk [vmem:[#allocation2 + $0xa0] sm:$0x3] %vm121_vm4, %v2039_v63 }
  0xc4   :  { %v816_v18 = vpop.permute.xlu0 %815  ;;  %v818_v19 = vpop.permute.xlu1 %817 }
  0xc5   :  { %879 = vst.msk [vmem:[#allocation2 - $0x2] sm:$0xfc] %vm878_vm14, %v816_v18 }
  0xc6   :  { %881 = vst.msk [vmem:[#allocation2 + $0x6] sm:$0xff] %vm880_vm15, %v818_v19  ;;  %562 = vrot.lane.b32.xlu0 %v63_v45, %s1347_s23  ;;  %582 = vrot.lane.b32.xlu1 %v73_v48, %s1347_s23  ;;  %v96_v48 = vld [vmem:[%s2370_s0 + $0x298] sm:$0xff]  ;;  %v87_v19 = vld [vmem:[%s2370_s0 + $0x250] sm:$0xff] }
  0xc8   :  { %v173_v1 = vpop.permute.xlu0 %172  ;;  %v557_v2 = vpop.permute.xlu1 %556 }
  0xc9   :  { %222 = vst.msk [vmem:[#allocation2 + $0x70] sm:$0xff] %vm207_vm3, %v173_v1 }
  0xca   :  { %619 = vst.msk [vmem:[#allocation2 + $0xf] sm:$0xff] %vm617_vm9, %v557_v2  ;;  %265 = vrot.lane.b32.xlu0 %v1648_v46, %s1344_s14  ;;  %285 = vrot.lane.b32.xlu1 %v1653_v47, %s1344_s14 }
  0xcc   :  { %v573_v3 = vpop.permute.xlu0 %572  ;;  %v575_v4 = vpop.permute.xlu1 %574 }
  0xcd   :  { %v902_v5 = vld [vmem:[#allocation2] sm:$0xff]  ;;  %627 = vst.msk [vmem:[#allocation2 + $0x4f] sm:$0xff] %vm617_vm9, %v573_v3  ;;  %628 = vst.msk [vmem:[#allocation2 + $0x57] sm:$0xff] %vm617_vm9, %v575_v4 }
  0xce   :  { %1258 = vmatmul.mubr.msk.f32.vlgmr.msra.gmra.mrb[0].mxu0 %vm935_vm1, %v902_v5  ;;  %650 = vrot.lane.b32.xlu0 %v1569_v29, %s1348_s28  ;;  %v97_v3 = vld [vmem:[%s2370_s0 + $0x2a0] sm:$0xff]  ;;  %v2067_v5 = vld [vmem:[%s2370_s0 + $0x150] sm:$0xff] }
  0xcf   :  { %670 = vrot.lane.b32.xlu1 %v1574_v30, %s1348_s28  ;;  %1260 = vmatprep.mubr.msk.f32.mxu0 %vm1352_vm2, %v1351_v51 }
  0xd0   :  { %v577_v13 = vpop.permute.xlu0 %576  ;;  %v260_v16 = vpop.permute.xlu1 %259 }
  0xd1   :  { %629 = vst.msk [vmem:[#allocation2 + $0x5f] sm:$0xff] %vm617_vm9, %v577_v13 }
  0xd2   :  { %320 = vst.msk [vmem:[#allocation2 + $0x1f] sm:$0xff] %vm316_vm5, %v260_v16  ;;  %371 = vrot.lane.b32.xlu0 %v64_v8, %s1345_s30 }
  0xd3   :  { %391 = vrot.lane.b32.xlu1 %v74_v12, %s1345_s30 }
  0xd4   :  { %v280_v17 = vpop.permute.xlu0 %279  ;;  %v645_v21 = vpop.permute.xlu1 %644 }
  0xd5   :  { %330 = vst.msk [vmem:[#allocation2 + $0x6f] sm:$0xff] %vm316_vm5, %v280_v17 }
  0xd6   :  { %707 = vst.msk [vmem:[#allocation2 + $0xf] sm:$0xff] %vm705_vm11, %v645_v21  ;;  %738 = vrot.lane.b32.xlu0 %v1820_v37, %s1349_s18 }
  0xd7   :  { %758 = vrot.lane.b32.xlu1 %v1825_v38, %s1349_s18  ;;  %v65_v38 = vld [vmem:[%s2370_s0 + $0x198] sm:$0xff] }
  0xd8   :  { %v661_v27 = vpop.permute.xlu0 %660  ;;  %v663_v28 = vpop.permute.xlu1 %662 }
  0xd9   :  { %715 = vst.msk [vmem:[#allocation2 + $0x4f] sm:$0xff] %vm705_vm11, %v661_v27  ;;  %716 = vst.msk [vmem:[#allocation2 + $0x57] sm:$0xff] %vm705_vm11, %v663_v28 }
  0xda   :  { %478 = vrot.lane.b32.xlu0 %v85_v22, %s1346_s8  ;;  %v77_v22 = vld [vmem:[%s2370_s0 + $0x1f8] sm:$0xff] }
  0xdb   :  { %498 = vrot.lane.b32.xlu1 %v95_v26, %s1346_s8 }
  0xdc   :  { %v665_v31 = vpop.permute.xlu0 %664  ;;  %v366_v33 = vpop.permute.xlu1 %365 }
  0xdd   :  { %717 = vst.msk [vmem:[#allocation2 + $0x5f] sm:$0xff] %vm705_vm11, %v665_v31 }
  0xde   :  { %426 = vst.msk [vmem:[#allocation2 + $0x18] sm:$0xff] %vm422_vm6, %v366_v33  ;;  %825 = vrot.lane.b32.xlu0 %v1569_v29, %s1353_s1  ;;  %v98_v33 = vld [vmem:[%s2370_s0 + $0x2a8] sm:$0xff] }
  0xdf   :  { %845 = vrot.lane.b32.xlu1 %v1574_v30, %s1353_s1 }
  0xe0   :  { %v386_v35 = vpop.permute.xlu0 %385  ;;  %v733_v7 = vpop.permute.xlu1 %732 }
  0xe1   :  { %436 = vst.msk [vmem:[#allocation2 + $0x68] sm:$0xff] %vm422_vm6, %v386_v35 }
  0xe2   :  { %795 = vst.msk [vmem:[#allocation2 + $0xf] sm:$0xff] %vm793_vm13, %v733_v7  ;;  %180 = vrot.lane.b32.xlu0 %v1948_v34, %s1343_s16 }
  0xe3   :  { %564 = vrot.lane.b32.xlu1 %v64_v8, %s1347_s23 }
  0xe4   :  { %v749_v29 = vpop.permute.xlu0 %748  ;;  %v751_v36 = vpop.permute.xlu1 %750 }
  0xe5   :  { %803 = vst.msk [vmem:[#allocation2 + $0x4f] sm:$0xff] %vm793_vm13, %v749_v29  ;;  %804 = vst.msk [vmem:[#allocation2 + $0x57] sm:$0xff] %vm793_vm13, %v751_v36 }
  0xe6   :  { %584 = vrot.lane.b32.xlu0 %v74_v12, %s1347_s23 }
  0xe7   :  { %267 = vrot.lane.b32.xlu1 %v1506_v20, %s1344_s14 }
  0xe8   :  { %v753_v30 = vpop.permute.xlu0 %752  ;;  %v473_v37 = vpop.permute.xlu1 %472 }
  0xe9   :  { %805 = vst.msk [vmem:[#allocation2 + $0x5f] sm:$0xff] %vm793_vm13, %v753_v30 }
  0xea   :  { %533 = vst.msk [vmem:[#allocation2 + $0x18] sm:$0xff] %vm529_vm7, %v473_v37  ;;  %287 = vrot.lane.b32.xlu0 %v1709_v54, %s1344_s14 }
  0xeb   :  { %652 = vrot.lane.b32.xlu1 %v1648_v46, %s1348_s28 }
  0xec   :  { %v493_v39 = vpop.permute.xlu0 %492  ;;  %v820_v40 = vpop.permute.xlu1 %819 }
  0xed   :  { %543 = vst.msk [vmem:[#allocation2 + $0x68] sm:$0xff] %vm529_vm7, %v493_v39 }
  0xee   :  { %882 = vst.msk [vmem:[#allocation2 + $0xe] sm:$0xff] %vm880_vm15, %v820_v40  ;;  %672 = vrot.lane.b32.xlu0 %v1653_v47, %s1348_s28  ;;  %v99_v40 = vld [vmem:[%s2370_s0 + $0x2b0] sm:$0xff] }
  0xef   :  { %373 = vrot.lane.b32.xlu1 %v65_v38, %s1345_s30 }
  0xf0   :  { %v838_v15 = vpop.permute.xlu0 %837  ;;  %v840_v41 = vpop.permute.xlu1 %839 }
  0xf1   :  { %891 = vst.msk [vmem:[#allocation2 + $0x56] sm:$0xff] %vm880_vm15, %v838_v15  ;;  %892 = vst.msk [vmem:[#allocation2 + $0x5e] sm:$0xff] %vm880_vm15, %v840_v41 }
  0xf2   :  { %393 = vrot.lane.b32.xlu0 %v75_v14, %s1345_s30 }
  0xf3   :  { %740 = vrot.lane.b32.xlu1 %v1882_v61, %s1349_s18 }
  0xf4   :  { %v155_v43 = vpop.permute.xlu0 %154  ;;  %v175_v44 = vpop.permute.xlu1 %174 }
  0xf5   :  { %v903_v45 = vld [vmem:[#allocation2 + $0x8] sm:$0xff]  ;;  %213 = vst.msk [vmem:[#allocation2 + $0x28] sm:$0xff] %vm207_vm3, %v155_v43  ;;  %223 = vst.msk [vmem:[#allocation2 + $0x78] sm:$0xff] %vm207_vm3, %v175_v44  ;;  %v57_v43 = vld [vmem:[%s2370_s0 + $0x158] sm:$0xff] }
  0xf6   :  { %1261 = vmatmul.mubr.msk.f32.gmra.mrb[2].mxu0 %vm935_vm1, %v903_v45  ;;  %760 = vrot.lane.b32.xlu0 %v1887_v62, %s1349_s18  ;;  %v76_v62 = vld [vmem:[%s2370_s0 + $0x1f0] sm:$0xff] }
  0xf7   :  { %480 = vrot.lane.b32.xlu1 %v86_v42, %s1346_s8  ;;  %1263 = vmatprep.mubr.msk.f32.mxu0 %vm1352_vm2, %v1351_v51  ;;  %v35_v42 = vld [vmem:[%s2370_s0 + $0xa8] sm:$0xff] }
  0xf8   :  { %v559_v49 = vpop.permute.xlu0 %558  ;;  %v579_v50 = vpop.permute.xlu1 %578  ;;  %v913_v52 = vld [vmem:[#allocation2 + $0x58] sm:$0xff] }
  0xf9   :  { %620 = vst.msk [vmem:[#allocation2 + $0x17] sm:$0xff] %vm617_vm9, %v559_v49  ;;  %630 = vst.msk [vmem:[#allocation2 + $0x67] sm:$0xff] %vm617_vm9, %v579_v50  ;;  %1291 = vmatmul.mubr.msk.f32.vlgmr.msra.gmra.mrb[0].mxu1 %vm935_vm1, %v913_v52 }
  0xfa   :  { %500 = vrot.lane.b32.xlu0 %v96_v48, %s1346_s8  ;;  %1293 = vmatprep.mubr.msk.f32.mxu1 %vm1352_vm2, %v1351_v51 }
  0xfb   :  { %827 = vrot.lane.b32.xlu1 %v1648_v46, %s1353_s1 }
  0xfc   :  { %v262_v55 = vpop.permute.xlu0 %261  ;;  %v282_v56 = vpop.permute.xlu1 %281 }
  0xfd   :  { %321 = vst.msk [vmem:[#allocation2 + $0x27] sm:$0xff] %vm316_vm5, %v262_v55  ;;  %331 = vst.msk [vmem:[#allocation2 + $0x77] sm:$0xff] %vm316_vm5, %v282_v56 }
  0xfe   :  { %847 = vrot.lane.b32.xlu0 %v1653_v47, %s1353_s1  ;;  %v66_v47 = vld [vmem:[%s2370_s0 + $0x1a0] sm:$0xff] }
  0xff   :  { %182 = vrot.lane.b32.xlu1 %v2005_v53, %s1343_s16 }
 0x100   :  { %v647_v46 = vpop.permute.xlu0 %646  ;;  %v667_v57 = vpop.permute.xlu1 %666 }
 0x101   :  { %708 = vst.msk [vmem:[#allocation2 + $0x17] sm:$0xff] %vm705_vm11, %v647_v46  ;;  %718 = vst.msk [vmem:[#allocation2 + $0x67] sm:$0xff] %vm705_vm11, %v667_v57 }
 0x102   :  { %566 = vrot.lane.b32.xlu0 %v65_v38, %s1347_s23 }
 0x103   :  { %586 = vrot.lane.b32.xlu1 %v75_v14, %s1347_s23 }
 0x104   :  { %v368_v58 = vpop.permute.xlu0 %367  ;;  %v388_v59 = vpop.permute.xlu1 %387 }
 0x105   :  { %427 = vst.msk [vmem:[#allocation2 + $0x20] sm:$0xff] %vm422_vm6, %v368_v58  ;;  %437 = vst.msk [vmem:[#allocation2 + $0x70] sm:$0xff] %vm422_vm6, %v388_v59 }
 0x106   :  { %289 = vrot.lane.b32.xlu0 %v1768_v6, %s1344_s14 }
 0x107   :  { %654 = vrot.lane.b32.xlu1 %v1506_v20, %s1348_s28 }
 0x108   :  { %v735_v60 = vpop.permute.xlu0 %734  ;;  %v755_v61 = vpop.permute.xlu1 %754 }
 0x109   :  { %796 = vst.msk [vmem:[#allocation2 + $0x17] sm:$0xff] %vm793_vm13, %v735_v60  ;;  %806 = vst.msk [vmem:[#allocation2 + $0x67] sm:$0xff] %vm793_vm13, %v755_v61 }
 0x10a   :  { %674 = vrot.lane.b32.xlu0 %v1709_v54, %s1348_s28 }
 0x10b   :  { %375 = vrot.lane.b32.xlu1 %v66_v47, %s1345_s30 }
 0x10c   :  { %v475_v0 = vpop.permute.xlu0 %474  ;;  %v495_v18 = vpop.permute.xlu1 %494 }
 0x10d   :  { %534 = vst.msk [vmem:[#allocation2 + $0x20] sm:$0xff] %vm529_vm7, %v475_v0  ;;  %544 = vst.msk [vmem:[#allocation2 + $0x70] sm:$0xff] %vm529_vm7, %v495_v18 }
 0x10e   :  { %395 = vrot.lane.b32.xlu0 %v76_v62, %s1345_s30 }
 0x10f   :  { %742 = vrot.lane.b32.xlu1 %v1525_v23, %s1349_s18 }
 0x110   :  { %v822_v1 = vpop.permute.xlu0 %821  ;;  %v842_v2 = vpop.permute.xlu1 %841 }
 0x111   :  { %883 = vst.msk [vmem:[#allocation2 + $0x16] sm:$0xff] %vm880_vm15, %v822_v1  ;;  %893 = vst.msk [vmem:[#allocation2 + $0x66] sm:$0xff] %vm880_vm15, %v842_v2 }
 0x112   :  { %762 = vrot.lane.b32.xlu0 %v1948_v34, %s1349_s18 }
 0x113   :  { %482 = vrot.lane.b32.xlu1 %v87_v19, %s1346_s8 }
 0x114   :  { %v157_v23 = vpop.permute.xlu0 %156  ;;  %v177_v4 = vpop.permute.xlu1 %176 }
 0x115   :  { %214 = vst.msk [vmem:[#allocation2 + $0x30] sm:$0xff] %vm207_vm3, %v157_v23  ;;  %224 = vst.msk [vmem:[#allocation2 + $0x80] sm:$0xff] %vm207_vm3, %v177_v4 }
 0x116   :  { %502 = vrot.lane.b32.xlu0 %v97_v3, %s1346_s8 }
 0x117   :  { %829 = vrot.lane.b32.xlu1 %v1506_v20, %s1353_s1 }
 0x118   :  { %v561_v8 = vpop.permute.xlu0 %560  ;;  %v581_v12 = vpop.permute.xlu1 %580  ;;  %v904_v13 = vld [vmem:[#allocation2 + $0x10] sm:$0xff]  ;;  %v914_v16 = vld [vmem:[#allocation2 + $0x60] sm:$0xff] }
 0x119   :  { %621 = vst.msk [vmem:[#allocation2 + $0x1f] sm:$0xff] %vm617_vm9, %v561_v8  ;;  %631 = vst.msk [vmem:[#allocation2 + $0x6f] sm:$0xff] %vm617_vm9, %v581_v12  ;;  %1264 = vmatmul.mubr.msk.f32.gmra.mrb[4].mxu0 %vm935_vm1, %v904_v13  ;;  %1294 = vmatmul.mubr.msk.f32.gmra.mrb[2].mxu1 %vm935_vm1, %v914_v16 }
 0x11a   :  { %849 = vrot.lane.b32.xlu0 %v1709_v54, %s1353_s1  ;;  %1296 = vmatprep.mubr.msk.f32.mxu1 %vm1352_vm2, %v1351_v51 }
 0x11b   :  { %184 = vrot.lane.b32.xlu1 %v2067_v5, %s1343_s16  ;;  %1266 = vmatprep.mubr.msk.f32.mxu0 %vm1352_vm2, %v1351_v51 }
 0x11c   :  { %v264_v20 = vpop.permute.xlu0 %263  ;;  %v284_v17 = vpop.permute.xlu1 %283 }
 0x11d   :  { %322 = vst.msk [vmem:[#allocation2 + $0x2f] sm:$0xff] %vm316_vm5, %v264_v20  ;;  %332 = vst.msk [vmem:[#allocation2 + $0x7f] sm:$0xff] %vm316_vm5, %v284_v17 }
 0x11e   :  { %568 = vrot.lane.b32.xlu0 %v66_v47, %s1347_s23 }
 0x11f   :  { %588 = vrot.lane.b32.xlu1 %v76_v62, %s1347_s23 }
 0x120   :  { %v649_v54 = vpop.permute.xlu0 %648  ;;  %v669_v21 = vpop.permute.xlu1 %668 }
 0x121   :  { %709 = vst.msk [vmem:[#allocation2 + $0x1f] sm:$0xff] %vm705_vm11, %v649_v54  ;;  %719 = vst.msk [vmem:[#allocation2 + $0x6f] sm:$0xff] %vm705_vm11, %v669_v21 }
 0x122   :  { %291 = vrot.lane.b32.xlu0 %v2039_v63, %s1344_s14 }
 0x123   :  { %656 = vrot.lane.b32.xlu1 %v1432_v9, %s1348_s28 }
 0x124   :  { %v370_v26 = vpop.permute.xlu0 %369  ;;  %v390_v27 = vpop.permute.xlu1 %389 }
 0x125   :  { %428 = vst.msk [vmem:[#allocation2 + $0x28] sm:$0xff] %vm422_vm6, %v370_v26  ;;  %438 = vst.msk [vmem:[#allocation2 + $0x78] sm:$0xff] %vm422_vm6, %v390_v27 }
 0x126   :  { %676 = vrot.lane.b32.xlu0 %v1768_v6, %s1348_s28 }
 0x127   :  { %397 = vrot.lane.b32.xlu1 %v77_v22, %s1345_s30 }
 0x128   :  { %v737_v28 = vpop.permute.xlu0 %736  ;;  %v757_v31 = vpop.permute.xlu1 %756 }
 0x129   :  { %797 = vst.msk [vmem:[#allocation2 + $0x1f] sm:$0xff] %vm793_vm13, %v737_v28  ;;  %807 = vst.msk [vmem:[#allocation2 + $0x6f] sm:$0xff] %vm793_vm13, %v757_v31 }
 0x12a   :  { %744 = vrot.lane.b32.xlu0 %v1530_v24, %s1349_s18 }
 0x12b   :  { %764 = vrot.lane.b32.xlu1 %v2005_v53, %s1349_s18 }
 0x12c   :  { %v477_v34 = vpop.permute.xlu0 %476  ;;  %v497_v35 = vpop.permute.xlu1 %496 }
 0x12d   :  { %535 = vst.msk [vmem:[#allocation2 + $0x28] sm:$0xff] %vm529_vm7, %v477_v34  ;;  %545 = vst.msk [vmem:[#allocation2 + $0x78] sm:$0xff] %vm529_vm7, %v497_v35 }
 0x12e   :  { %504 = vrot.lane.b32.xlu0 %v98_v33, %s1346_s8 }
 0x12f   :  { %831 = vrot.lane.b32.xlu1 %v1432_v9, %s1353_s1  ;;  %v78_v9 = vld [vmem:[%s2370_s0 + $0x200] sm:$0xff] }
 0x130   :  { %v824_v7 = vpop.permute.xlu0 %823  ;;  %v844_v24 = vpop.permute.xlu1 %843 }
 0x131   :  { %884 = vst.msk [vmem:[#allocation2 + $0x1e] sm:$0xff] %vm880_vm15, %v824_v7  ;;  %894 = vst.msk [vmem:[#allocation2 + $0x6e] sm:$0xff] %vm880_vm15, %v844_v24 }
 0x132   :  { %851 = vrot.lane.b32.xlu0 %v1768_v6, %s1353_s1 }
 0x133   :  { %570 = vrot.lane.b32.xlu1 %v1602_v32, %s1347_s23 }
 0x134   :  { %v159_v29 = vpop.permute.xlu0 %158  ;;  %v179_v36 = vpop.permute.xlu1 %178 }
 0x135   :  { %215 = vst.msk [vmem:[#allocation2 + $0x38] sm:$0xff] %vm207_vm3, %v159_v29  ;;  %225 = vst.msk [vmem:[#allocation2 + $0x88] sm:$0xff] %vm207_vm3, %v179_v36 }
 0x136   :  { %590 = vrot.lane.b32.xlu0 %v77_v22, %s1347_s23 }
 0x137   :  { %658 = vrot.lane.b32.xlu1 %v1437_v10, %s1348_s28 }
 0x138   :  { %v563_v30 = vpop.permute.xlu0 %562  ;;  %v583_v6 = vpop.permute.xlu1 %582  ;;  %v905_v37 = vld [vmem:[#allocation2 + $0x18] sm:$0xff]  ;;  %v915_v38 = vld [vmem:[#allocation2 + $0x68] sm:$0xff] }
 0x139   :  { %622 = vst.msk [vmem:[#allocation2 + $0x27] sm:$0xff] %vm617_vm9, %v563_v30  ;;  %632 = vst.msk [vmem:[#allocation2 + $0x77] sm:$0xff] %vm617_vm9, %v583_v6  ;;  %1267 = vmatmul.mubr.msk.f32.gmra.mrb[6].mxu0 %vm935_vm1, %v905_v37  ;;  %1297 = vmatmul.mubr.msk.f32.gmra.mrb[4].mxu1 %vm935_vm1, %v915_v38  ;;  %v2231_v30 = vld [vmem:[%s2372_s2] ss:$0 sm:$0xff] }
 0x13a   :  { %678 = vrot.lane.b32.xlu0 %v2039_v63, %s1348_s28  ;;  %1299 = vmatprep.mubr.msk.f32.mxu1 %vm1352_vm2, %v1351_v51 }
 0x13b   :  { %399 = vrot.lane.b32.xlu1 %v78_v9, %s1345_s30  ;;  %1269 = vmatprep.mubr.msk.f32.mxu0 %vm1352_vm2, %v1351_v51 }
 0x13c   :  { %v266_v32 = vpop.permute.xlu0 %265  ;;  %v286_v39 = vpop.permute.xlu1 %285 }
 0x13d   :  { %323 = vst.msk [vmem:[#allocation2 + $0x37] sm:$0xff] %vm316_vm5, %v266_v32  ;;  %333 = vst.msk [vmem:[#allocation2 + $0x87] sm:$0xff] %vm316_vm5, %v286_v39 }
 0x13e   :  { %746 = vrot.lane.b32.xlu0 %v1539_v25, %s1349_s18 }
 0x13f   :  { %766 = vrot.lane.b32.xlu1 %v2067_v5, %s1349_s18 }
 0x140   :  { %v651_v14 = vpop.permute.xlu0 %650 }
 0x141   :  { %v671_v15 = vpop.permute.xlu1 %670  ;;  %710 = vst.msk [vmem:[#allocation2 + $0x27] sm:$0xff] %vm705_vm11, %v651_v14 }
 0x142   :  { %720 = vst.msk [vmem:[#allocation2 + $0x77] sm:$0xff] %vm705_vm11, %v671_v15  ;;  %506 = vrot.lane.b32.xlu0 %v99_v40, %s1346_s8 }
 0x143   :  { %833 = vrot.lane.b32.xlu1 %v1437_v10, %s1353_s1 }
 0x144   :  { %v372_v41 = vpop.permute.xlu0 %371 }
 0x145   :  { %v392_v25 = vpop.permute.xlu1 %391  ;;  %429 = vst.msk [vmem:[#allocation2 + $0x30] sm:$0xff] %vm422_vm6, %v372_v41 }
 0x146   :  { %439 = vst.msk [vmem:[#allocation2 + $0x80] sm:$0xff] %vm422_vm6, %v392_v25  ;;  %853 = vrot.lane.b32.xlu0 %v2039_v63, %s1353_s1 }
 0x147   :  { %592 = vrot.lane.b32.xlu1 %v78_v9, %s1347_s23 }
 0x148   :  { %v739_v10 = vpop.permute.xlu0 %738 }
 0x149   :  { %v759_v44 = vpop.permute.xlu1 %758  ;;  %798 = vst.msk [vmem:[#allocation2 + $0x27] sm:$0xff] %vm793_vm13, %v739_v10 }
 0x14a   :  { %808 = vst.msk [vmem:[#allocation2 + $0x77] sm:$0xff] %vm793_vm13, %v759_v44  ;;  %680 = vrot.lane.b32.xlu0 %v35_v42, %s1348_s28 }
 0x14b   :  { %768 = vrot.lane.b32.xlu1 %v57_v43, %s1349_s18 }
 0x14c   :  { %v479_v45 = vpop.permute.xlu0 %478 }
 0x14d   :  { %v499_v48 = vpop.permute.xlu1 %498  ;;  %536 = vst.msk [vmem:[#allocation2 + $0x30] sm:$0xff] %vm529_vm7, %v479_v45 }
 0x14e   :  { %546 = vst.msk [vmem:[#allocation2 + $0x80] sm:$0xff] %vm529_vm7, %v499_v48  ;;  %835 = vrot.lane.b32.xlu0 %v1442_v11, %s1353_s1 }
 0x14f   :  { %855 = vrot.lane.b32.xlu1 %v35_v42, %s1353_s1 }
 0x150   :  { %v826_v49 = vpop.permute.xlu0 %825 }
 0x151   :  { %v846_v50 = vpop.permute.xlu1 %845  ;;  %885 = vst.msk [vmem:[#allocation2 + $0x26] sm:$0xff] %vm880_vm15, %v826_v49 }
 0x152   :  { %895 = vst.msk [vmem:[#allocation2 + $0x76] sm:$0xff] %vm880_vm15, %v846_v50 }
 0x154   :  { %v181_v52 = vpop.permute.xlu0 %180 }
 0x155   :  { %v565_v53 = vpop.permute.xlu1 %564  ;;  %226 = vst.msk [vmem:[#allocation2 + $0x90] sm:$0xff] %vm207_vm3, %v181_v52 }
 0x156   :  { %623 = vst.msk [vmem:[#allocation2 + $0x2f] sm:$0xff] %vm617_vm9, %v565_v53 }
 0x158   :  { %v585_v55 = vpop.permute.xlu0 %584  ;;  %v906_v46 = vld [vmem:[#allocation2 + $0x20] sm:$0xff] }
 0x159   :  { %v268_v56 = vpop.permute.xlu1 %267  ;;  %v916_v57 = vld [vmem:[#allocation2 + $0x70] sm:$0xff]  ;;  %633 = vst.msk [vmem:[#allocation2 + $0x7f] sm:$0xff] %vm617_vm9, %v585_v55  ;;  %1270 = vmatmul.mubr.msk.f32.gmra.mrb[8].mxu0 %vm935_vm1, %v906_v46 }
 0x15a   :  { %324 = vst.msk [vmem:[#allocation2 + $0x3f] sm:$0xff] %vm316_vm5, %v268_v56  ;;  %1300 = vmatmul.mubr.msk.f32.gmra.mrb[6].mxu1 %vm935_vm1, %v916_v57  ;;  %1272 = vmatprep.mubr.msk.f32.mxu0 %vm1352_vm2, %v1351_v51 }
 0x15b   :  { %1302 = vmatprep.mubr.msk.f32.mxu1 %vm1352_vm2, %v1351_v51 }
 0x15c   :  { %v288_v11 = vpop.permute.xlu0 %287 }
 0x15d   :  { %v653_v58 = vpop.permute.xlu1 %652  ;;  %334 = vst.msk [vmem:[#allocation2 + $0x8f] sm:$0xff] %vm316_vm5, %v288_v11 }
 0x15e   :  { %711 = vst.msk [vmem:[#allocation2 + $0x2f] sm:$0xff] %vm705_vm11, %v653_v58 }
 0x160   :  { %v673_v59 = vpop.permute.xlu0 %672 }
 0x161   :  { %v374_v47 = vpop.permute.xlu1 %373  ;;  %721 = vst.msk [vmem:[#allocation2 + $0x7f] sm:$0xff] %vm705_vm11, %v673_v59 }
 0x162   :  { %430 = vst.msk [vmem:[#allocation2 + $0x38] sm:$0xff] %vm422_vm6, %v374_v47 }
 0x164   :  { %v394_v60 = vpop.permute.xlu0 %393 }
 0x165   :  { %v741_v61 = vpop.permute.xlu1 %740  ;;  %440 = vst.msk [vmem:[#allocation2 + $0x88] sm:$0xff] %vm422_vm6, %v394_v60 }
 0x166   :  { %799 = vst.msk [vmem:[#allocation2 + $0x2f] sm:$0xff] %vm793_vm13, %v741_v61 }
 0x168   :  { %v761_v62 = vpop.permute.xlu0 %760 }
 0x169   :  { %v481_v63 = vpop.permute.xlu1 %480  ;;  %809 = vst.msk [vmem:[#allocation2 + $0x7f] sm:$0xff] %vm793_vm13, %v761_v62 }
 0x16a   :  { %537 = vst.msk [vmem:[#allocation2 + $0x38] sm:$0xff] %vm529_vm7, %v481_v63 }
 0x16c   :  { %v501_v0 = vpop.permute.xlu0 %500 }
 0x16d   :  { %v828_v18 = vpop.permute.xlu1 %827  ;;  %547 = vst.msk [vmem:[#allocation2 + $0x88] sm:$0xff] %vm529_vm7, %v501_v0 }
 0x16e   :  { %886 = vst.msk [vmem:[#allocation2 + $0x2e] sm:$0xff] %vm880_vm15, %v828_v18 }
 0x170   :  { %v848_v19 = vpop.permute.xlu0 %847 }
 0x171   :  { %v183_v1 = vpop.permute.xlu1 %182  ;;  %896 = vst.msk [vmem:[#allocation2 + $0x7e] sm:$0xff] %vm880_vm15, %v848_v19 }
 0x172   :  { %227 = vst.msk [vmem:[#allocation2 + $0x98] sm:$0xff] %vm207_vm3, %v183_v1  ;;  %vm228_vm3 = vcmask 58400  }
 0x174   :  { %v567_v2 = vpop.permute.xlu0 %566 }
 0x175   :  { %v587_v3 = vpop.permute.xlu1 %586  ;;  %v907_v23 = vld [vmem:[#allocation2 + $0x28] sm:$0xff]  ;;  %624 = vst.msk [vmem:[#allocation2 + $0x37] sm:$0xff] %vm617_vm9, %v567_v2 }
 0x176   :  { %634 = vst.msk [vmem:[#allocation2 + $0x87] sm:$0xff] %vm617_vm9, %v587_v3  ;;  %1273 = vmatmul.mubr.msk.f32.gmra.mrb[10].mxu0 %vm935_vm1, %v907_v23 }
 0x177   :  { %1275 = vmatprep.mubr.msk.f32.mxu0 %vm1352_vm2, %v1351_v51 }
 0x178   :  { %v290_v4 = vpop.permute.xlu0 %289  ;;  %v917_v8 = vld [vmem:[#allocation2 + $0x78] sm:$0xff] }
 0x179   :  { %v655_v5 = vpop.permute.xlu1 %654  ;;  %335 = vst.msk [vmem:[#allocation2 + $0x97] sm:$0xff] %vm316_vm5, %v290_v4  ;;  %1303 = vmatmul.mubr.msk.f32.gmra.mrb[8].mxu1 %vm935_vm1, %v917_v8  ;;  %vm336_vm5 = vcmask 92224  }
 0x17a   :  { %712 = vst.msk [vmem:[#allocation2 + $0x37] sm:$0xff] %vm705_vm11, %v655_v5  ;;  %1305 = vmatprep.mubr.msk.f32.mxu1 %vm1352_vm2, %v1351_v51 }
 0x17c   :  { %v675_v12 = vpop.permute.xlu0 %674 }
 0x17d   :  { %v376_v13 = vpop.permute.xlu1 %375  ;;  %722 = vst.msk [vmem:[#allocation2 + $0x87] sm:$0xff] %vm705_vm11, %v675_v12 }
 0x17e   :  { %431 = vst.msk [vmem:[#allocation2 + $0x40] sm:$0xff] %vm422_vm6, %v376_v13 }
 0x180   :  { %v396_v16 = vpop.permute.xlu0 %395 }
 0x181   :  { %v743_v20 = vpop.permute.xlu1 %742  ;;  %441 = vst.msk [vmem:[#allocation2 + $0x90] sm:$0xff] %vm422_vm6, %v396_v16 }
 0x182   :  { %800 = vst.msk [vmem:[#allocation2 + $0x37] sm:$0xff] %vm793_vm13, %v743_v20 }
 0x184   :  { %v763_v17 = vpop.permute.xlu0 %762 }
 0x185   :  { %v483_v54 = vpop.permute.xlu1 %482  ;;  %810 = vst.msk [vmem:[#allocation2 + $0x87] sm:$0xff] %vm793_vm13, %v763_v17 }
 0x186   :  { %538 = vst.msk [vmem:[#allocation2 + $0x40] sm:$0xff] %vm529_vm7, %v483_v54 }
 0x188   :  { %v503_v21 = vpop.permute.xlu0 %502 }
 0x189   :  { %v830_v22 = vpop.permute.xlu1 %829  ;;  %548 = vst.msk [vmem:[#allocation2 + $0x90] sm:$0xff] %vm529_vm7, %v503_v21 }
 0x18a   :  { %887 = vst.msk [vmem:[#allocation2 + $0x36] sm:$0xff] %vm880_vm15, %v830_v22 }
 0x18c   :  { %v850_v26 = vpop.permute.xlu0 %849 }
 0x18d   :  { %v185_v27 = vpop.permute.xlu1 %184  ;;  %897 = vst.msk [vmem:[#allocation2 + $0x86] sm:$0xff] %vm880_vm15, %v850_v26 }
 0x18e   :  { %229 = vst.msk [vmem:[#allocation2 + $0xa0] sm:$0x3] %vm228_vm3, %v185_v27 }
 0x190   :  { %v569_v28 = vpop.permute.xlu0 %568 }
 0x191   :  { %v589_v31 = vpop.permute.xlu1 %588  ;;  %v908_v33 = vld [vmem:[#allocation2 + $0x30] sm:$0xff]  ;;  %625 = vst.msk [vmem:[#allocation2 + $0x3f] sm:$0xff] %vm617_vm9, %v569_v28 }
 0x192   :  { %635 = vst.msk [vmem:[#allocation2 + $0x8f] sm:$0xff] %vm617_vm9, %v589_v31  ;;  %1276 = vmatmul.mubr.msk.f32.gmra.mrb[12].mxu0 %vm935_vm1, %v908_v33 }
 0x193   :  { %1278 = vmatprep.mubr.msk.f32.mxu0 %vm1352_vm2, %v1351_v51 }
 0x194   :  { %v292_v34 = vpop.permute.xlu0 %291  ;;  %v918_v7 = vld [vmem:[#allocation2 + $0x80] sm:$0xff] }
 0x195   :  { %v657_v35 = vpop.permute.xlu1 %656  ;;  %337 = vst.msk [vmem:[#allocation2 + $0x9f] sm:$0x7] %vm336_vm5, %v292_v34  ;;  %1306 = vmatmul.mubr.msk.f32.gmra.mrb[10].mxu1 %vm935_vm1, %v918_v7 }
 0x196   :  { %713 = vst.msk [vmem:[#allocation2 + $0x3f] sm:$0xff] %vm705_vm11, %v657_v35  ;;  %1308 = vmatprep.mubr.msk.f32.mxu1 %vm1352_vm2, %v1351_v51 }
 0x198   :  { %v677_v24 = vpop.permute.xlu0 %676 }
 0x199   :  { %v398_v29 = vpop.permute.xlu1 %397  ;;  %723 = vst.msk [vmem:[#allocation2 + $0x8f] sm:$0xff] %vm705_vm11, %v677_v24 }
 0x19a   :  { %442 = vst.msk [vmem:[#allocation2 + $0x98] sm:$0xff] %vm422_vm6, %v398_v29  ;;  %vm443_vm6 = vcmask 124000  }
 0x19c   :  { %v745_v36 = vpop.permute.xlu0 %744 }
 0x19d   :  { %v765_v9 = vpop.permute.xlu1 %764  ;;  %801 = vst.msk [vmem:[#allocation2 + $0x3f] sm:$0xff] %vm793_vm13, %v745_v36 }
 0x19e   :  { %811 = vst.msk [vmem:[#allocation2 + $0x8f] sm:$0xff] %vm793_vm13, %v765_v9 }
 0x1a0   :  { %v505_v6 = vpop.permute.xlu0 %504 }
 0x1a1   :  { %v832_v37 = vpop.permute.xlu1 %831  ;;  %549 = vst.msk [vmem:[#allocation2 + $0x98] sm:$0xff] %vm529_vm7, %v505_v6  ;;  %v1069_v38 = vpop.f32.mrb[0].mxu0  ;;  %vm550_vm7 = vcmask 156800  }
 0x1a2   :  { %888 = vst.msk [vmem:[#allocation2 + $0x3e] sm:$0xff] %vm880_vm15, %v832_v37  ;;  %v1070_v32 = vadd.f32 %v2231_v30, %v1069_v38  ;;  %v1259_v39 = vpop.f32.mrb[1].mxu0 }
 0x1a4   :  { %1173 = vst.msk [vmem:[%s2373_s3] sm:$0xff] %vm100_vm0, %v1070_v32  ;;  %v852_v40 = vpop.permute.xlu0 %851 }
 0x1a5   :  { %v571_v14 = vpop.permute.xlu1 %570  ;;  %898 = vst.msk [vmem:[#allocation2 + $0x8e] sm:$0xff] %vm880_vm15, %v852_v40 }
 0x1a6   :  { %626 = vst.msk [vmem:[#allocation2 + $0x47] sm:$0xff] %vm617_vm9, %v571_v14 }
 0x1a8   :  { %v591_v15 = vpop.permute.xlu0 %590 }
 0x1a9   :  { %v659_v41 = vpop.permute.xlu1 %658  ;;  %v909_v25 = vld [vmem:[#allocation2 + $0x38] sm:$0xff]  ;;  %636 = vst.msk [vmem:[#allocation2 + $0x97] sm:$0xff] %vm617_vm9, %v591_v15  ;;  %vm725_vm9 = vcmask 223424  }
 0x1aa   :  { %714 = vst.msk [vmem:[#allocation2 + $0x47] sm:$0xff] %vm705_vm11, %v659_v41  ;;  %1279 = vmatmul.mubr.msk.f32.gmra.mrb[14].mxu0 %vm935_vm1, %v909_v25 }
 0x1ab   :  { %1281 = vmatprep.mubr.msk.f32.mxu0 %vm1352_vm2, %v1351_v51 }
 0x1ac   :  { %v679_v42 = vpop.permute.xlu0 %678  ;;  %v919_v10 = vld [vmem:[#allocation2 + $0x88] sm:$0xff] }
 0x1ad   :  { %v400_v43 = vpop.permute.xlu1 %399  ;;  %724 = vst.msk [vmem:[#allocation2 + $0x97] sm:$0xff] %vm705_vm11, %v679_v42  ;;  %1309 = vmatmul.mubr.msk.f32.gmra.mrb[12].mxu1 %vm935_vm1, %v919_v10  ;;  %vm900_vm11 = vcmask 290048  }
 0x1ae   :  { %444 = vst.msk [vmem:[#allocation2 + $0xa0] sm:$0x3] %vm443_vm6, %v400_v43  ;;  %1311 = vmatprep.mubr.msk.f32.mxu1 %vm1352_vm2, %v1351_v51 }
 0x1b0   :  { %v747_v44 = vpop.permute.xlu0 %746 }
 0x1b1   :  { %v767_v45 = vpop.permute.xlu1 %766  ;;  %802 = vst.msk [vmem:[#allocation2 + $0x47] sm:$0xff] %vm793_vm13, %v747_v44 }
 0x1b2   :  { %812 = vst.msk [vmem:[#allocation2 + $0x97] sm:$0xff] %vm793_vm13, %v767_v45 }
 0x1b4   :  { %v507_v48 = vpop.permute.xlu0 %506 }
 0x1b5   :  { %v834_v49 = vpop.permute.xlu1 %833  ;;  %551 = vst.msk [vmem:[#allocation2 + $0xa0] sm:$0x3] %vm550_vm7, %v507_v48 }
 0x1b6   :  { %889 = vst.msk [vmem:[#allocation2 + $0x46] sm:$0xff] %vm880_vm15, %v834_v49 }
 0x1b8   :  { %v854_v50 = vpop.permute.xlu0 %853 }
 0x1b9   :  { %v593_v52 = vpop.permute.xlu1 %592  ;;  %899 = vst.msk [vmem:[#allocation2 + $0x96] sm:$0xff] %vm880_vm15, %v854_v50 }
 0x1ba   :  { %638 = vst.msk [vmem:[#allocation2 + $0x9f] sm:$0x7] %vm637_vm8, %v593_v52 }
 0x1bc   :  { %v681_v53 = vpop.permute.xlu0 %680 }
 0x1bd   :  { %v769_v55 = vpop.permute.xlu1 %768  ;;  %v910_v56 = vld [vmem:[#allocation2 + $0x40] sm:$0xff]  ;;  %726 = vst.msk [vmem:[#allocation2 + $0x9f] sm:$0x7] %vm725_vm9, %v681_v53 }
 0x1be   :  { %1282 = vmatmul.mubr.msk.f32.gmra.mrb[16].mxu0 %vm935_vm1, %v910_v56  ;;  %814 = vst.msk [vmem:[#allocation2 + $0x9f] sm:$0x7] %vm813_vm10, %v769_v55 }
 0x1bf   :  { %1284 = vmatprep.mubr.msk.f32.mxu0 %vm1352_vm2, %v1351_v51 }
 0x1c0   :  { %v836_v46 = vpop.permute.xlu0 %835  ;;  %v920_v11 = vld [vmem:[#allocation2 + $0x90] sm:$0xff] }
 0x1c1   :  { %v856_v57 = vpop.permute.xlu1 %855  ;;  %890 = vst.msk [vmem:[#allocation2 + $0x4e] sm:$0xff] %vm880_vm15, %v836_v46  ;;  %1312 = vmatmul.mubr.msk.f32.gmra.mrb[14].mxu1 %vm935_vm1, %v920_v11 }
 0x1c2   :  { %901 = vst.msk [vmem:[#allocation2 + $0x9e] sm:$0xf] %vm900_vm11, %v856_v57  ;;  %1314 = vmatprep.mubr.msk.f32.mxu1 %vm1352_vm2, %v1351_v51 }
 0x1c8   :  { %v911_v59 = vld [vmem:[#allocation2 + $0x48] sm:$0xff]  ;;  %v912_v63 = vld [vmem:[#allocation2 + $0x50] sm:$0xff] }
 0x1c9   :  { %v1074_v58 = vpop.f32.mrb[2].mxu0  ;;  %v921_v47 = vld [vmem:[#allocation2 + $0x98] sm:$0xff]  ;;  %1285 = vmatmul.mubr.msk.f32.gmra.mrb[18].mxu0 %vm935_vm1, %v911_v59  ;;  %v922_v0 = vld [vmem:[#allocation2 + $0xa0] sm:$0x3] }
 0x1ca   :  { %v1075_v60 = vadd.f32 %v2231_v30, %v1074_v58  ;;  %v1262_v61 = vpop.f32.mrb[3].mxu0  ;;  %1315 = vmatmul.mubr.msk.f32.gmra.mrb[16].mxu1 %vm935_vm1, %v921_v47  ;;  %1287 = vmatprep.mubr.msk.f32.mxu0 %vm1352_vm2, %v1351_v51 }
 0x1cb   :  { %1317 = vmatprep.mubr.msk.f32.mxu1 %vm1352_vm2, %v1351_v51 }
 0x1cc   :  { %1174 = vst.msk [vmem:[%s2373_s3 + $0x8] sm:$0xff] %vm100_vm0, %v1075_v60  ;;  %v1124_v62 = vpop.f32.mrb[0].mxu1 }
 0x1cd   :  { %v1125_v18 = vadd.f32 %v2231_v30, %v1124_v62  ;;  %1288 = vmatmul.mubr.msk.f32.gmra.mrb[20].mxu0 %vm935_vm1, %v912_v63  ;;  %v1292_v19 = vpop.f32.mrb[1].mxu1 }
 0x1ce   :  { %1318 = vmatmul.mubr.msk.f32.gmra.mrb[18].mxu1 %vm935_vm1, %v922_v0 }
 0x1cf   :  { %1184 = vst.msk [vmem:[%s2373_s3 + $0x58] sm:$0xff] %vm100_vm0, %v1125_v18 }
 0x1ec   :  { %v1079_v51 = vpop.f32.mrb[4].mxu0  ;;  %v1129_v1 = vpop.f32.mrb[2].mxu1 }
 0x1ed   :  { %v1080_v2 = vadd.f32 %v2231_v30, %v1079_v51  ;;  %v1130_v3 = vadd.f32 %v2231_v30, %v1129_v1  ;;  %v1265_v23 = vpop.f32.mrb[5].mxu0  ;;  %v1295_v4 = vpop.f32.mrb[3].mxu1 }
 0x1ef   :  { %1175 = vst.msk [vmem:[%s2373_s3 + $0x10] sm:$0xff] %vm100_vm0, %v1080_v2  ;;  %1185 = vst.msk [vmem:[%s2373_s3 + $0x60] sm:$0xff] %vm100_vm0, %v1130_v3 }
 0x20c   :  { %v1084_v5 = vpop.f32.mrb[6].mxu0  ;;  %v1134_v8 = vpop.f32.mrb[4].mxu1 }
 0x20d   :  { %v1085_v12 = vadd.f32 %v2231_v30, %v1084_v5  ;;  %v1135_v13 = vadd.f32 %v2231_v30, %v1134_v8  ;;  %v1268_v16 = vpop.f32.mrb[7].mxu0  ;;  %v1298_v20 = vpop.f32.mrb[5].mxu1 }
 0x20f   :  { %1176 = vst.msk [vmem:[%s2373_s3 + $0x18] sm:$0xff] %vm100_vm0, %v1085_v12  ;;  %1186 = vst.msk [vmem:[%s2373_s3 + $0x68] sm:$0xff] %vm100_vm0, %v1135_v13 }
 0x22c   :  { %v1089_v17 = vpop.f32.mrb[8].mxu0 }
 0x22d   :  { %v1139_v54 = vpop.f32.mrb[6].mxu1  ;;  %v1090_v21 = vadd.f32 %v2231_v30, %v1089_v17  ;;  %v1271_v26 = vpop.f32.mrb[9].mxu0 }
 0x22e   :  { %v1140_v22 = vadd.f32 %v2231_v30, %v1139_v54  ;;  %v1301_v27 = vpop.f32.mrb[7].mxu1 }
 0x22f   :  { %1177 = vst.msk [vmem:[%s2373_s3 + $0x20] sm:$0xff] %vm100_vm0, %v1090_v21 }
 0x230   :  { %1187 = vst.msk [vmem:[%s2373_s3 + $0x70] sm:$0xff] %vm100_vm0, %v1140_v22 }
 0x249   :  { %v1094_v28 = vpop.f32.mrb[10].mxu0 }
 0x24a   :  { %v1095_v31 = vadd.f32 %v2231_v30, %v1094_v28  ;;  %v1274_v33 = vpop.f32.mrb[11].mxu0 }
 0x24c   :  { %1178 = vst.msk [vmem:[%s2373_s3 + $0x28] sm:$0xff] %vm100_vm0, %v1095_v31  ;;  %v1144_v34 = vpop.f32.mrb[8].mxu1 }
 0x24d   :  { %v1145_v35 = vadd.f32 %v2231_v30, %v1144_v34  ;;  %v1304_v7 = vpop.f32.mrb[9].mxu1 }
 0x24f   :  { %1188 = vst.msk [vmem:[%s2373_s3 + $0x78] sm:$0xff] %vm100_vm0, %v1145_v35 }
 0x265   :  { %v1099_v24 = vpop.f32.mrb[12].mxu0 }
 0x266   :  { %v1100_v29 = vadd.f32 %v2231_v30, %v1099_v24  ;;  %v1277_v36 = vpop.f32.mrb[13].mxu0 }
 0x268   :  { %1179 = vst.msk [vmem:[%s2373_s3 + $0x30] sm:$0xff] %vm100_vm0, %v1100_v29  ;;  %v1149_v9 = vpop.f32.mrb[10].mxu1 }
 0x269   :  { %v1150_v6 = vadd.f32 %v2231_v30, %v1149_v9  ;;  %v1307_v37 = vpop.f32.mrb[11].mxu1 }
 0x26b   :  { %1189 = vst.msk [vmem:[%s2373_s3 + $0x80] sm:$0xff] %vm100_vm0, %v1150_v6 }
 0x27d   :  { %v1104_v38 = vpop.f32.mrb[14].mxu0 }
 0x27e   :  { %v1105_v32 = vadd.f32 %v2231_v30, %v1104_v38  ;;  %v1280_v39 = vpop.f32.mrb[15].mxu0 }
 0x280   :  { %1180 = vst.msk [vmem:[%s2373_s3 + $0x38] sm:$0xff] %vm100_vm0, %v1105_v32  ;;  %v1154_v40 = vpop.f32.mrb[12].mxu1 }
 0x281   :  { %v1155_v14 = vadd.f32 %v2231_v30, %v1154_v40  ;;  %v1310_v15 = vpop.f32.mrb[13].mxu1 }
 0x283   :  { %1190 = vst.msk [vmem:[%s2373_s3 + $0x88] sm:$0xff] %vm100_vm0, %v1155_v14 }
 0x291   :  { %v1109_v41 = vpop.f32.mrb[16].mxu0 }
 0x292   :  { %v1110_v25 = vadd.f32 %v2231_v30, %v1109_v41  ;;  %v1283_v42 = vpop.f32.mrb[17].mxu0 }
 0x294   :  { %1181 = vst.msk [vmem:[%s2373_s3 + $0x40] sm:$0xff] %vm100_vm0, %v1110_v25  ;;  %v1159_v43 = vpop.f32.mrb[14].mxu1 }
 0x295   :  { %v1160_v10 = vadd.f32 %v2231_v30, %v1159_v43  ;;  %v1313_v44 = vpop.f32.mrb[15].mxu1 }
 0x297   :  { %1191 = vst.msk [vmem:[%s2373_s3 + $0x90] sm:$0xff] %vm100_vm0, %v1160_v10 }
 0x29c   :  { %v1114_v45 = vpop.f32.mrb[18].mxu0 }
 0x29d   :  { %v1164_v48 = vpop.f32.mrb[16].mxu1  ;;  %v1115_v49 = vadd.f32 %v2231_v30, %v1114_v45  ;;  %v1286_v52 = vpop.f32.mrb[19].mxu0 }
 0x29e   :  { %v1165_v50 = vadd.f32 %v2231_v30, %v1164_v48  ;;  %v1316_v53 = vpop.f32.mrb[17].mxu1 }
 0x29f   :  { %1182 = vst.msk [vmem:[%s2373_s3 + $0x48] sm:$0xff] %vm100_vm0, %v1115_v49 }
 0x2a0   :  { %1192 = vst.msk [vmem:[%s2373_s3 + $0x98] sm:$0xff] %vm100_vm0, %v1165_v50  ;;  %v1119_v55 = vpop.f32.mrb[20].mxu0 }
 0x2a1   :  { %v1169_v56 = vpop.f32.mrb[18].mxu1  ;;  %v1120_v46 = vadd.f32 %v2231_v30, %v1119_v55  ;;  %v1289_v11 = vpop.f32.mrb[21].mxu0 }
 0x2a2   :  { %v1170_v57 = vadd.f32 %v2231_v30, %v1169_v56  ;;  %v1319_v58 = vpop.f32.mrb[19].mxu1 }
 0x2a3   :  { %1183 = vst.msk [vmem:[%s2373_s3 + $0x50] sm:$0xff] %vm100_vm0, %v1120_v46 }
 0x2a4   :  { %1193 = vst.msk [vmem:[%s2373_s3 + $0xa0] sm:$0x3] %vm121_vm4, %v1170_v57 }

</bundles_post_ra>
